<compile_context>
chip_gen: v7x
topology: tpu7x:2x2x1
jax: 0.10.0
libtpu: 0.0.40
codegen_flags: <defaults>
</compile_context>

<pallas_src>
import jax
import jax.numpy as jnp
from jax.experimental import pallas as pl
from jax.experimental.pallas import tpu as pltpu


# ----------------------------- Pallas kernel -------------------------------
def make_lstm_reg_kernel(S, BP, H, I, O):
    fourH = 4 * H
    i_is_one = (I == 1)
    o_is_one = (O == 1)

    def kernel(x2_ref,                 # (S*BP, I)     flattened padded input
               wih0_ref, b0_ref,       # (I, 4H), (1, 4H)   b0 = b_ih0 + b_hh0
               whh0_ref,               # (H, 4H)
               wih1_ref, whh1_ref,     # (H, 4H), (H, 4H)   (UN-fused, see above)
               b1_ref,                 # (1, 4H)            b1 = b_ih1 + b_hh1
               wfc_ref, bfc_ref,       # (1, H) if O==1 else (H, O); (1, O)
               out_ref,                # (S*BP, O)
               hs_ref):                # scratch (S*BP, H): layer-1 outputs

        # ---- hoisted, time-independent input projection --------------------
        if i_is_one:
            # rank-1 update on the VPU: (S*BP,1) * (1,4H) broadcast == x @ W
            xp2d = x2_ref[...] * wih0_ref[...] + b0_ref[...]
        else:
            xp2d = (jnp.dot(x2_ref[...], wih0_ref[...],
                            preferred_element_type=jnp.float32) + b0_ref[...])
        # xp2d: (S*BP, 4H), kept register-resident (8 vregs at this size)

        # ---- hoist loop-invariant weight / bias loads -----------------------
        whh0 = whh0_ref[...]                                  # (H, 4H)
        wih1 = wih1_ref[...]                                  # (H, 4H)
        whh1 = whh1_ref[...]                                  # (H, 4H)
        b1 = jnp.broadcast_to(b1_ref[...], (BP, fourH))       # hoisted broadcast

        # zero-init states (PyTorch default when (h0, c0) not provided)
        h0 = jnp.zeros((BP, H), jnp.float32)
        c0 = jnp.zeros((BP, H), jnp.float32)
        h1 = jnp.zeros((BP, H), jnp.float32)
        c1 = jnp.zeros((BP, H), jnp.float32)

        def gate_split(gates, c_prev):
            # Full-vreg EUP passes (sigmoid + tanh over the whole 4H tile),
            # then cheap lane slices. The lanes that are later discarded are
            # safe to evaluate because both functions are bounded (no inf/NaN).
            sig = jax.nn.sigmoid(gates)
            tnh = jnp.tanh(gates)
            i = sig[:, 0 * H:1 * H]
            f = sig[:, 1 * H:2 * H]
            o = sig[:, 3 * H:4 * H]
            g = tnh[:, 2 * H:3 * H]
            c_new = f * c_prev + i * g
            h_new = o * jnp.tanh(c_new)
            return h_new, c_new

        # ---- fully unrolled recurrence (S is small & static) ----------------
        for t in range(S):
            # layer 0: x-projection precomputed -> one dependent MXU push
            gates0 = xp2d[t * BP:(t + 1) * BP, :] + jnp.dot(
                h0, whh0, preferred_element_type=jnp.float32)
            h0, c0 = gate_split(gates0, c0)

            # layer 1: un-fused. h1 @ Whh1 does not depend on h0_t, so it can
            # issue early; only h0 @ Wih1 + gate_split sits on the h0_t path.
            rec1 = jnp.dot(h1, whh1, preferred_element_type=jnp.float32) + b1
            gates1 = jnp.dot(h0, wih1, preferred_element_type=jnp.float32) + rec1
            h1, c1 = gate_split(gates1, c1)

            hs_ref[pl.ds(t * BP, BP), :] = h1                  # lane-dense store

        # ---- FC head, once, batched over all time steps ---------------------
        hs = hs_ref[...]                                       # (S*BP, H)
        if o_is_one:
            # N=1: VPU multiply + XLU lane reduce instead of a degenerate MXU call
            y = (jnp.sum(hs * wfc_ref[...], axis=-1, keepdims=True)
                 + bfc_ref[...])                               # (S*BP, 1)
        else:
            y = (jnp.dot(hs, wfc_ref[...], preferred_element_type=jnp.float32)
                 + bfc_ref[...])                               # (S*BP, O)
        out_ref[...] = y.astype(out_ref.dtype)

    return kernel


# ------------------------------- wrapper ------------------------------------
def lstm_regression_forward(x, params):
    """x: (S, B, input_size) float32 -> (S, B, output_size) float32."""
    S, B, I = x.shape
    H = params["whh0"].shape[0]
    O = params["wfc"].shape[1]

    # pad batch onto the f32 sublane count (8)
    BP = ((B + 7) // 8) * 8
    x_p = x if BP == B else jnp.pad(x, ((0, 0), (0, BP - B), (0, 0)))
    x2d = x_p.reshape(S * BP, I)

    # O == 1: pass the FC weight as a (1, H) row so the kernel does a VPU
    # multiply + lane reduce with no in-kernel transpose.
    wfc_arg = params["wfc"].T if O == 1 else params["wfc"]

    kernel = pl.pallas_call(
        make_lstm_reg_kernel(S, BP, H, I, O),
        out_shape=jax.ShapeDtypeStruct((S * BP, O), jnp.float32),
        in_specs=[pl.BlockSpec(memory_space=pltpu.MemorySpace.VMEM)] * 9,
        out_specs=pl.BlockSpec(memory_space=pltpu.MemorySpace.VMEM),
        scratch_shapes=[
            pltpu.VMEM((S * BP, H), jnp.float32),   # per-step layer-1 outputs
        ],
    )
    out = kernel(x2d,
                 params["wih0"], params["b0"], params["whh0"],
                 params["wih1"], params["whh1"], params["b1"],
                 wfc_arg, params["bfc"])
    return out.reshape(S, BP, O)[:, :B, :]


# --------------------------- deterministic params ---------------------------
def init_params(key, input_size, hidden_size, output_size=1):
    H = hidden_size
    bound = 1.0 / (H ** 0.5)
    ks = jax.random.split(key, 10)

    def u(k, shape):
        return jax.random.uniform(k, shape, jnp.float32, -bound, bound)

    # PyTorch stores weight_ih_l0 as (4H, in); we store the transpose (in, 4H).
    return {
        "wih0": u(ks[0], (input_size, 4 * H)),
        "whh0": u(ks[1], (H, 4 * H)),
        "b0":   u(ks[2], (1, 4 * H)) + u(ks[3], (1, 4 * H)),   # b_ih + b_hh
        "wih1": u(ks[4], (H, 4 * H)),
        "whh1": u(ks[5], (H, 4 * H)),
        "b1":   u(ks[6], (1, 4 * H)) + u(ks[7], (1, 4 * H)),
        "wfc":  u(ks[8], (H, output_size)),
        "bfc":  u(ks[9], (1, output_size)),
    }


# ---------------------------- pure-JAX reference -----------------------------
def reference_forward(x, params):
    H = params["whh0"].shape[0]
    S, B, _ = x.shape

    def cell(x_t, h, c, wih, whh, b):
        g = x_t @ wih + h @ whh + b
        i = jax.nn.sigmoid(g[:, 0 * H:1 * H])
        f = jax.nn.sigmoid(g[:, 1 * H:2 * H])
        gg = jnp.tanh(g[:, 2 * H:3 * H])
        o = jax.nn.sigmoid(g[:, 3 * H:4 * H])
        c = f * c + i * gg
        h = o * jnp.tanh(c)
        return h, c

    def step(carry, x_t):
        h0, c0, h1, c1 = carry
        h0, c0 = cell(x_t, h0, c0, params["wih0"], params["whh0"], params["b0"])
        h1, c1 = cell(h0, h1, c1, params["wih1"], params["whh1"], params["b1"])
        y = h1 @ params["wfc"] + params["bfc"]
        return (h0, c0, h1, c1), y

    z = jnp.zeros((B, H), jnp.float32)
    _, ys = jax.lax.scan(step, (z, z, z, z), x)
    return ys


# --------------------------------- main --------------------------------------
if __name__ == "__main__":
    S, B, INPUT, HIDDEN, OUTPUT = 8, 2, 1, 32, 1

    key = jax.random.PRNGKey(0)
    kx, kp = jax.random.split(key)
    x = jax.random.normal(kx, (S, B, INPUT), jnp.float32)
    params = init_params(kp, INPUT, HIDDEN, OUTPUT)

    out = lstm_regression_forward(x, params)
    out = jax.block_until_ready(out)

    ref = jax.block_until_ready(reference_forward(x, params))
    assert out.shape == (S, B, OUTPUT)
    assert jnp.allclose(out, ref, rtol=1e-4, atol=1e-4), "mismatch vs JAX reference"

    print("KERNEL_OK")
</pallas_src>

<mosaic_0001>
module attributes {stable_mosaic.version = 11 : i64} {
  func.func @kernel(%arg0: memref<64x1xf32, #tpu.memory_space<vmem>>, %arg1: memref<1x128xf32, #tpu.memory_space<vmem>>, %arg2: memref<1x128xf32, #tpu.memory_space<vmem>>, %arg3: memref<32x128xf32, #tpu.memory_space<vmem>>, %arg4: memref<32x128xf32, #tpu.memory_space<vmem>>, %arg5: memref<32x128xf32, #tpu.memory_space<vmem>>, %arg6: memref<1x128xf32, #tpu.memory_space<vmem>>, %arg7: memref<1x32xf32, #tpu.memory_space<vmem>>, %arg8: memref<1x1xf32, #tpu.memory_space<vmem>>, %arg9: memref<64x1xf32, #tpu.memory_space<vmem>>, %arg10: memref<64x32xf32, #tpu.memory_space<vmem>>) attributes {dimension_semantics = [], scalar_prefetch = 0 : i64, scratch_operands = 1 : i64, tpu.core_type = #tpu.core_type<tc>} {
    %c0 = arith.constant 0 : index
    %c0_0 = arith.constant 0 : index
    %0 = vector.load %arg0[%c0, %c0_0] : memref<64x1xf32, #tpu.memory_space<vmem>>, vector<64x1xf32>
    %c0_1 = arith.constant 0 : index
    %c0_2 = arith.constant 0 : index
    %1 = vector.load %arg1[%c0_1, %c0_2] : memref<1x128xf32, #tpu.memory_space<vmem>>, vector<1x128xf32>
    %2 = vector.broadcast %0 : vector<64x1xf32> to vector<64x128xf32>
    %3 = vector.broadcast %1 : vector<1x128xf32> to vector<64x128xf32>
    %4 = arith.mulf %2, %3 : vector<64x128xf32>
    %c0_3 = arith.constant 0 : index
    %c0_4 = arith.constant 0 : index
    %5 = vector.load %arg2[%c0_3, %c0_4] : memref<1x128xf32, #tpu.memory_space<vmem>>, vector<1x128xf32>
    %6 = vector.broadcast %5 : vector<1x128xf32> to vector<64x128xf32>
    %7 = arith.addf %4, %6 : vector<64x128xf32>
    %c0_5 = arith.constant 0 : index
    %c0_6 = arith.constant 0 : index
    %8 = vector.load %arg3[%c0_5, %c0_6] : memref<32x128xf32, #tpu.memory_space<vmem>>, vector<32x128xf32>
    %c0_7 = arith.constant 0 : index
    %c0_8 = arith.constant 0 : index
    %9 = vector.load %arg4[%c0_7, %c0_8] : memref<32x128xf32, #tpu.memory_space<vmem>>, vector<32x128xf32>
    %c0_9 = arith.constant 0 : index
    %c0_10 = arith.constant 0 : index
    %10 = vector.load %arg5[%c0_9, %c0_10] : memref<32x128xf32, #tpu.memory_space<vmem>>, vector<32x128xf32>
    %c0_11 = arith.constant 0 : index
    %c0_12 = arith.constant 0 : index
    %11 = vector.load %arg6[%c0_11, %c0_12] : memref<1x128xf32, #tpu.memory_space<vmem>>, vector<1x128xf32>
    %12 = vector.shape_cast %11 : vector<1x128xf32> to vector<1x128xf32>
    %13 = vector.broadcast %12 : vector<1x128xf32> to vector<8x128xf32>
    %cst = arith.constant 0.000000e+00 : f32
    %14 = vector.broadcast %cst : f32 to vector<8x32xf32>
    %cst_13 = arith.constant 0.000000e+00 : f32
    %15 = vector.broadcast %cst_13 : f32 to vector<8x32xf32>
    %cst_14 = arith.constant 0.000000e+00 : f32
    %16 = vector.broadcast %cst_14 : f32 to vector<8x32xf32>
    %cst_15 = arith.constant 0.000000e+00 : f32
    %17 = vector.broadcast %cst_15 : f32 to vector<8x32xf32>
    %18 = vector.extract_strided_slice %7 {offsets = [0, 0], sizes = [8, 128], strides = [1, 1]} : vector<64x128xf32> to vector<8x128xf32>
    %cst_16 = arith.constant dense<0.000000e+00> : vector<8x128xf32>
    %19 = tpu.matmul %14, %8, %cst_16 {dimension_numbers = #tpu.dot_dimension_numbers<[1], [0], [0], [1], [0, 0, 1, 1], [], []>} : vector<8x32xf32>, vector<32x128xf32>, vector<8x128xf32> -> vector<8x128xf32>
    %20 = arith.addf %18, %19 : vector<8x128xf32>
    %21 = arith.negf %20 : vector<8x128xf32>
    %22 = math.exp %21 : vector<8x128xf32>
    %cst_17 = arith.constant 1.000000e+00 : f32
    %23 = vector.broadcast %cst_17 : f32 to vector<8x128xf32>
    %24 = arith.addf %23, %22 : vector<8x128xf32>
    %25 = arith.divf %23, %24 : vector<8x128xf32>
    %26 = math.tanh %20 : vector<8x128xf32>
    %27 = vector.extract_strided_slice %25 {offsets = [0, 0], sizes = [8, 32], strides = [1, 1]} : vector<8x128xf32> to vector<8x32xf32>
    %28 = vector.extract_strided_slice %25 {offsets = [0, 32], sizes = [8, 32], strides = [1, 1]} : vector<8x128xf32> to vector<8x32xf32>
    %29 = vector.extract_strided_slice %25 {offsets = [0, 96], sizes = [8, 32], strides = [1, 1]} : vector<8x128xf32> to vector<8x32xf32>
    %30 = vector.extract_strided_slice %26 {offsets = [0, 64], sizes = [8, 32], strides = [1, 1]} : vector<8x128xf32> to vector<8x32xf32>
    %31 = arith.mulf %28, %15 : vector<8x32xf32>
    %32 = arith.mulf %27, %30 : vector<8x32xf32>
    %33 = arith.addf %31, %32 : vector<8x32xf32>
    %34 = math.tanh %33 : vector<8x32xf32>
    %35 = arith.mulf %29, %34 : vector<8x32xf32>
    %cst_18 = arith.constant dense<0.000000e+00> : vector<8x128xf32>
    %36 = tpu.matmul %16, %10, %cst_18 {dimension_numbers = #tpu.dot_dimension_numbers<[1], [0], [0], [1], [0, 0, 1, 1], [], []>} : vector<8x32xf32>, vector<32x128xf32>, vector<8x128xf32> -> vector<8x128xf32>
    %37 = arith.addf %36, %13 : vector<8x128xf32>
    %cst_19 = arith.constant dense<0.000000e+00> : vector<8x128xf32>
    %38 = tpu.matmul %35, %9, %cst_19 {dimension_numbers = #tpu.dot_dimension_numbers<[1], [0], [0], [1], [0, 0, 1, 1], [], []>} : vector<8x32xf32>, vector<32x128xf32>, vector<8x128xf32> -> vector<8x128xf32>
    %39 = arith.addf %38, %37 : vector<8x128xf32>
    %40 = arith.negf %39 : vector<8x128xf32>
    %41 = math.exp %40 : vector<8x128xf32>
    %cst_20 = arith.constant 1.000000e+00 : f32
    %42 = vector.broadcast %cst_20 : f32 to vector<8x128xf32>
    %43 = arith.addf %42, %41 : vector<8x128xf32>
    %44 = arith.divf %42, %43 : vector<8x128xf32>
    %45 = math.tanh %39 : vector<8x128xf32>
    %46 = vector.extract_strided_slice %44 {offsets = [0, 0], sizes = [8, 32], strides = [1, 1]} : vector<8x128xf32> to vector<8x32xf32>
    %47 = vector.extract_strided_slice %44 {offsets = [0, 32], sizes = [8, 32], strides = [1, 1]} : vector<8x128xf32> to vector<8x32xf32>
    %48 = vector.extract_strided_slice %44 {offsets = [0, 96], sizes = [8, 32], strides = [1, 1]} : vector<8x128xf32> to vector<8x32xf32>
    %49 = vector.extract_strided_slice %45 {offsets = [0, 64], sizes = [8, 32], strides = [1, 1]} : vector<8x128xf32> to vector<8x32xf32>
    %50 = arith.mulf %47, %17 : vector<8x32xf32>
    %51 = arith.mulf %46, %49 : vector<8x32xf32>
    %52 = arith.addf %50, %51 : vector<8x32xf32>
    %53 = math.tanh %52 : vector<8x32xf32>
    %54 = arith.mulf %48, %53 : vector<8x32xf32>
    %c0_21 = arith.constant 0 : index
    %c0_22 = arith.constant 0 : index
    %55 = vector.load %arg10[%c0_21, %c0_22] : memref<64x32xf32, #tpu.memory_space<vmem>>, vector<8x32xf32>
    tpu.vector_store %arg10[%c0_21, %c0_22], %54 {strides = array<i32>} : memref<64x32xf32, #tpu.memory_space<vmem>>, vector<8x32xf32>,
    %56 = vector.extract_strided_slice %7 {offsets = [8, 0], sizes = [8, 128], strides = [1, 1]} : vector<64x128xf32> to vector<8x128xf32>
    %cst_23 = arith.constant dense<0.000000e+00> : vector<8x128xf32>
    %57 = tpu.matmul %35, %8, %cst_23 {dimension_numbers = #tpu.dot_dimension_numbers<[1], [0], [0], [1], [0, 0, 1, 1], [], []>} : vector<8x32xf32>, vector<32x128xf32>, vector<8x128xf32> -> vector<8x128xf32>
    %58 = arith.addf %56, %57 : vector<8x128xf32>
    %59 = arith.negf %58 : vector<8x128xf32>
    %60 = math.exp %59 : vector<8x128xf32>
    %cst_24 = arith.constant 1.000000e+00 : f32
    %61 = vector.broadcast %cst_24 : f32 to vector<8x128xf32>
    %62 = arith.addf %61, %60 : vector<8x128xf32>
    %63 = arith.divf %61, %62 : vector<8x128xf32>
    %64 = math.tanh %58 : vector<8x128xf32>
    %65 = vector.extract_strided_slice %63 {offsets = [0, 0], sizes = [8, 32], strides = [1, 1]} : vector<8x128xf32> to vector<8x32xf32>
    %66 = vector.extract_strided_slice %63 {offsets = [0, 32], sizes = [8, 32], strides = [1, 1]} : vector<8x128xf32> to vector<8x32xf32>
    %67 = vector.extract_strided_slice %63 {offsets = [0, 96], sizes = [8, 32], strides = [1, 1]} : vector<8x128xf32> to vector<8x32xf32>
    %68 = vector.extract_strided_slice %64 {offsets = [0, 64], sizes = [8, 32], strides = [1, 1]} : vector<8x128xf32> to vector<8x32xf32>
    %69 = arith.mulf %66, %33 : vector<8x32xf32>
    %70 = arith.mulf %65, %68 : vector<8x32xf32>
    %71 = arith.addf %69, %70 : vector<8x32xf32>
    %72 = math.tanh %71 : vector<8x32xf32>
    %73 = arith.mulf %67, %72 : vector<8x32xf32>
    %cst_25 = arith.constant dense<0.000000e+00> : vector<8x128xf32>
    %74 = tpu.matmul %54, %10, %cst_25 {dimension_numbers = #tpu.dot_dimension_numbers<[1], [0], [0], [1], [0, 0, 1, 1], [], []>} : vector<8x32xf32>, vector<32x128xf32>, vector<8x128xf32> -> vector<8x128xf32>
    %75 = arith.addf %74, %13 : vector<8x128xf32>
    %cst_26 = arith.constant dense<0.000000e+00> : vector<8x128xf32>
    %76 = tpu.matmul %73, %9, %cst_26 {dimension_numbers = #tpu.dot_dimension_numbers<[1], [0], [0], [1], [0, 0, 1, 1], [], []>} : vector<8x32xf32>, vector<32x128xf32>, vector<8x128xf32> -> vector<8x128xf32>
    %77 = arith.addf %76, %75 : vector<8x128xf32>
    %78 = arith.negf %77 : vector<8x128xf32>
    %79 = math.exp %78 : vector<8x128xf32>
    %cst_27 = arith.constant 1.000000e+00 : f32
    %80 = vector.broadcast %cst_27 : f32 to vector<8x128xf32>
    %81 = arith.addf %80, %79 : vector<8x128xf32>
    %82 = arith.divf %80, %81 : vector<8x128xf32>
    %83 = math.tanh %77 : vector<8x128xf32>
    %84 = vector.extract_strided_slice %82 {offsets = [0, 0], sizes = [8, 32], strides = [1, 1]} : vector<8x128xf32> to vector<8x32xf32>
    %85 = vector.extract_strided_slice %82 {offsets = [0, 32], sizes = [8, 32], strides = [1, 1]} : vector<8x128xf32> to vector<8x32xf32>
    %86 = vector.extract_strided_slice %82 {offsets = [0, 96], sizes = [8, 32], strides = [1, 1]} : vector<8x128xf32> to vector<8x32xf32>
    %87 = vector.extract_strided_slice %83 {offsets = [0, 64], sizes = [8, 32], strides = [1, 1]} : vector<8x128xf32> to vector<8x32xf32>
    %88 = arith.mulf %85, %52 : vector<8x32xf32>
    %89 = arith.mulf %84, %87 : vector<8x32xf32>
    %90 = arith.addf %88, %89 : vector<8x32xf32>
    %91 = math.tanh %90 : vector<8x32xf32>
    %92 = arith.mulf %86, %91 : vector<8x32xf32>
    %c8 = arith.constant 8 : index
    %c0_28 = arith.constant 0 : index
    %93 = vector.load %arg10[%c8, %c0_28] : memref<64x32xf32, #tpu.memory_space<vmem>>, vector<8x32xf32>
    tpu.vector_store %arg10[%c8, %c0_28], %92 {strides = array<i32>} : memref<64x32xf32, #tpu.memory_space<vmem>>, vector<8x32xf32>,
    %94 = vector.extract_strided_slice %7 {offsets = [16, 0], sizes = [8, 128], strides = [1, 1]} : vector<64x128xf32> to vector<8x128xf32>
    %cst_29 = arith.constant dense<0.000000e+00> : vector<8x128xf32>
    %95 = tpu.matmul %73, %8, %cst_29 {dimension_numbers = #tpu.dot_dimension_numbers<[1], [0], [0], [1], [0, 0, 1, 1], [], []>} : vector<8x32xf32>, vector<32x128xf32>, vector<8x128xf32> -> vector<8x128xf32>
    %96 = arith.addf %94, %95 : vector<8x128xf32>
    %97 = arith.negf %96 : vector<8x128xf32>
    %98 = math.exp %97 : vector<8x128xf32>
    %cst_30 = arith.constant 1.000000e+00 : f32
    %99 = vector.broadcast %cst_30 : f32 to vector<8x128xf32>
    %100 = arith.addf %99, %98 : vector<8x128xf32>
    %101 = arith.divf %99, %100 : vector<8x128xf32>
    %102 = math.tanh %96 : vector<8x128xf32>
    %103 = vector.extract_strided_slice %101 {offsets = [0, 0], sizes = [8, 32], strides = [1, 1]} : vector<8x128xf32> to vector<8x32xf32>
    %104 = vector.extract_strided_slice %101 {offsets = [0, 32], sizes = [8, 32], strides = [1, 1]} : vector<8x128xf32> to vector<8x32xf32>
    %105 = vector.extract_strided_slice %101 {offsets = [0, 96], sizes = [8, 32], strides = [1, 1]} : vector<8x128xf32> to vector<8x32xf32>
    %106 = vector.extract_strided_slice %102 {offsets = [0, 64], sizes = [8, 32], strides = [1, 1]} : vector<8x128xf32> to vector<8x32xf32>
    %107 = arith.mulf %104, %71 : vector<8x32xf32>
    %108 = arith.mulf %103, %106 : vector<8x32xf32>
    %109 = arith.addf %107, %108 : vector<8x32xf32>
    %110 = math.tanh %109 : vector<8x32xf32>
    %111 = arith.mulf %105, %110 : vector<8x32xf32>
    %cst_31 = arith.constant dense<0.000000e+00> : vector<8x128xf32>
    %112 = tpu.matmul %92, %10, %cst_31 {dimension_numbers = #tpu.dot_dimension_numbers<[1], [0], [0], [1], [0, 0, 1, 1], [], []>} : vector<8x32xf32>, vector<32x128xf32>, vector<8x128xf32> -> vector<8x128xf32>
    %113 = arith.addf %112, %13 : vector<8x128xf32>
    %cst_32 = arith.constant dense<0.000000e+00> : vector<8x128xf32>
    %114 = tpu.matmul %111, %9, %cst_32 {dimension_numbers = #tpu.dot_dimension_numbers<[1], [0], [0], [1], [0, 0, 1, 1], [], []>} : vector<8x32xf32>, vector<32x128xf32>, vector<8x128xf32> -> vector<8x128xf32>
    %115 = arith.addf %114, %113 : vector<8x128xf32>
    %116 = arith.negf %115 : vector<8x128xf32>
    %117 = math.exp %116 : vector<8x128xf32>
    %cst_33 = arith.constant 1.000000e+00 : f32
    %118 = vector.broadcast %cst_33 : f32 to vector<8x128xf32>
    %119 = arith.addf %118, %117 : vector<8x128xf32>
    %120 = arith.divf %118, %119 : vector<8x128xf32>
    %121 = math.tanh %115 : vector<8x128xf32>
    %122 = vector.extract_strided_slice %120 {offsets = [0, 0], sizes = [8, 32], strides = [1, 1]} : vector<8x128xf32> to vector<8x32xf32>
    %123 = vector.extract_strided_slice %120 {offsets = [0, 32], sizes = [8, 32], strides = [1, 1]} : vector<8x128xf32> to vector<8x32xf32>
    %124 = vector.extract_strided_slice %120 {offsets = [0, 96], sizes = [8, 32], strides = [1, 1]} : vector<8x128xf32> to vector<8x32xf32>
    %125 = vector.extract_strided_slice %121 {offsets = [0, 64], sizes = [8, 32], strides = [1, 1]} : vector<8x128xf32> to vector<8x32xf32>
    %126 = arith.mulf %123, %90 : vector<8x32xf32>
    %127 = arith.mulf %122, %125 : vector<8x32xf32>
    %128 = arith.addf %126, %127 : vector<8x32xf32>
    %129 = math.tanh %128 : vector<8x32xf32>
    %130 = arith.mulf %124, %129 : vector<8x32xf32>
    %c16 = arith.constant 16 : index
    %c0_34 = arith.constant 0 : index
    %131 = vector.load %arg10[%c16, %c0_34] : memref<64x32xf32, #tpu.memory_space<vmem>>, vector<8x32xf32>
    tpu.vector_store %arg10[%c16, %c0_34], %130 {strides = array<i32>} : memref<64x32xf32, #tpu.memory_space<vmem>>, vector<8x32xf32>,
    %132 = vector.extract_strided_slice %7 {offsets = [24, 0], sizes = [8, 128], strides = [1, 1]} : vector<64x128xf32> to vector<8x128xf32>
    %cst_35 = arith.constant dense<0.000000e+00> : vector<8x128xf32>
    %133 = tpu.matmul %111, %8, %cst_35 {dimension_numbers = #tpu.dot_dimension_numbers<[1], [0], [0], [1], [0, 0, 1, 1], [], []>} : vector<8x32xf32>, vector<32x128xf32>, vector<8x128xf32> -> vector<8x128xf32>
    %134 = arith.addf %132, %133 : vector<8x128xf32>
    %135 = arith.negf %134 : vector<8x128xf32>
    %136 = math.exp %135 : vector<8x128xf32>
    %cst_36 = arith.constant 1.000000e+00 : f32
    %137 = vector.broadcast %cst_36 : f32 to vector<8x128xf32>
    %138 = arith.addf %137, %136 : vector<8x128xf32>
    %139 = arith.divf %137, %138 : vector<8x128xf32>
    %140 = math.tanh %134 : vector<8x128xf32>
    %141 = vector.extract_strided_slice %139 {offsets = [0, 0], sizes = [8, 32], strides = [1, 1]} : vector<8x128xf32> to vector<8x32xf32>
    %142 = vector.extract_strided_slice %139 {offsets = [0, 32], sizes = [8, 32], strides = [1, 1]} : vector<8x128xf32> to vector<8x32xf32>
    %143 = vector.extract_strided_slice %139 {offsets = [0, 96], sizes = [8, 32], strides = [1, 1]} : vector<8x128xf32> to vector<8x32xf32>
    %144 = vector.extract_strided_slice %140 {offsets = [0, 64], sizes = [8, 32], strides = [1, 1]} : vector<8x128xf32> to vector<8x32xf32>
    %145 = arith.mulf %142, %109 : vector<8x32xf32>
    %146 = arith.mulf %141, %144 : vector<8x32xf32>
    %147 = arith.addf %145, %146 : vector<8x32xf32>
    %148 = math.tanh %147 : vector<8x32xf32>
    %149 = arith.mulf %143, %148 : vector<8x32xf32>
    %cst_37 = arith.constant dense<0.000000e+00> : vector<8x128xf32>
    %150 = tpu.matmul %130, %10, %cst_37 {dimension_numbers = #tpu.dot_dimension_numbers<[1], [0], [0], [1], [0, 0, 1, 1], [], []>} : vector<8x32xf32>, vector<32x128xf32>, vector<8x128xf32> -> vector<8x128xf32>
    %151 = arith.addf %150, %13 : vector<8x128xf32>
    %cst_38 = arith.constant dense<0.000000e+00> : vector<8x128xf32>
    %152 = tpu.matmul %149, %9, %cst_38 {dimension_numbers = #tpu.dot_dimension_numbers<[1], [0], [0], [1], [0, 0, 1, 1], [], []>} : vector<8x32xf32>, vector<32x128xf32>, vector<8x128xf32> -> vector<8x128xf32>
    %153 = arith.addf %152, %151 : vector<8x128xf32>
    %154 = arith.negf %153 : vector<8x128xf32>
    %155 = math.exp %154 : vector<8x128xf32>
    %cst_39 = arith.constant 1.000000e+00 : f32
    %156 = vector.broadcast %cst_39 : f32 to vector<8x128xf32>
    %157 = arith.addf %156, %155 : vector<8x128xf32>
    %158 = arith.divf %156, %157 : vector<8x128xf32>
    %159 = math.tanh %153 : vector<8x128xf32>
    %160 = vector.extract_strided_slice %158 {offsets = [0, 0], sizes = [8, 32], strides = [1, 1]} : vector<8x128xf32> to vector<8x32xf32>
    %161 = vector.extract_strided_slice %158 {offsets = [0, 32], sizes = [8, 32], strides = [1, 1]} : vector<8x128xf32> to vector<8x32xf32>
    %162 = vector.extract_strided_slice %158 {offsets = [0, 96], sizes = [8, 32], strides = [1, 1]} : vector<8x128xf32> to vector<8x32xf32>
    %163 = vector.extract_strided_slice %159 {offsets = [0, 64], sizes = [8, 32], strides = [1, 1]} : vector<8x128xf32> to vector<8x32xf32>
    %164 = arith.mulf %161, %128 : vector<8x32xf32>
    %165 = arith.mulf %160, %163 : vector<8x32xf32>
    %166 = arith.addf %164, %165 : vector<8x32xf32>
    %167 = math.tanh %166 : vector<8x32xf32>
    %168 = arith.mulf %162, %167 : vector<8x32xf32>
    %c24 = arith.constant 24 : index
    %c0_40 = arith.constant 0 : index
    %169 = vector.load %arg10[%c24, %c0_40] : memref<64x32xf32, #tpu.memory_space<vmem>>, vector<8x32xf32>
    tpu.vector_store %arg10[%c24, %c0_40], %168 {strides = array<i32>} : memref<64x32xf32, #tpu.memory_space<vmem>>, vector<8x32xf32>,
    %170 = vector.extract_strided_slice %7 {offsets = [32, 0], sizes = [8, 128], strides = [1, 1]} : vector<64x128xf32> to vector<8x128xf32>
    %cst_41 = arith.constant dense<0.000000e+00> : vector<8x128xf32>
    %171 = tpu.matmul %149, %8, %cst_41 {dimension_numbers = #tpu.dot_dimension_numbers<[1], [0], [0], [1], [0, 0, 1, 1], [], []>} : vector<8x32xf32>, vector<32x128xf32>, vector<8x128xf32> -> vector<8x128xf32>
    %172 = arith.addf %170, %171 : vector<8x128xf32>
    %173 = arith.negf %172 : vector<8x128xf32>
    %174 = math.exp %173 : vector<8x128xf32>
    %cst_42 = arith.constant 1.000000e+00 : f32
    %175 = vector.broadcast %cst_42 : f32 to vector<8x128xf32>
    %176 = arith.addf %175, %174 : vector<8x128xf32>
    %177 = arith.divf %175, %176 : vector<8x128xf32>
    %178 = math.tanh %172 : vector<8x128xf32>
    %179 = vector.extract_strided_slice %177 {offsets = [0, 0], sizes = [8, 32], strides = [1, 1]} : vector<8x128xf32> to vector<8x32xf32>
    %180 = vector.extract_strided_slice %177 {offsets = [0, 32], sizes = [8, 32], strides = [1, 1]} : vector<8x128xf32> to vector<8x32xf32>
    %181 = vector.extract_strided_slice %177 {offsets = [0, 96], sizes = [8, 32], strides = [1, 1]} : vector<8x128xf32> to vector<8x32xf32>
    %182 = vector.extract_strided_slice %178 {offsets = [0, 64], sizes = [8, 32], strides = [1, 1]} : vector<8x128xf32> to vector<8x32xf32>
    %183 = arith.mulf %180, %147 : vector<8x32xf32>
    %184 = arith.mulf %179, %182 : vector<8x32xf32>
    %185 = arith.addf %183, %184 : vector<8x32xf32>
    %186 = math.tanh %185 : vector<8x32xf32>
    %187 = arith.mulf %181, %186 : vector<8x32xf32>
    %cst_43 = arith.constant dense<0.000000e+00> : vector<8x128xf32>
    %188 = tpu.matmul %168, %10, %cst_43 {dimension_numbers = #tpu.dot_dimension_numbers<[1], [0], [0], [1], [0, 0, 1, 1], [], []>} : vector<8x32xf32>, vector<32x128xf32>, vector<8x128xf32> -> vector<8x128xf32>
    %189 = arith.addf %188, %13 : vector<8x128xf32>
    %cst_44 = arith.constant dense<0.000000e+00> : vector<8x128xf32>
    %190 = tpu.matmul %187, %9, %cst_44 {dimension_numbers = #tpu.dot_dimension_numbers<[1], [0], [0], [1], [0, 0, 1, 1], [], []>} : vector<8x32xf32>, vector<32x128xf32>, vector<8x128xf32> -> vector<8x128xf32>
    %191 = arith.addf %190, %189 : vector<8x128xf32>
    %192 = arith.negf %191 : vector<8x128xf32>
    %193 = math.exp %192 : vector<8x128xf32>
    %cst_45 = arith.constant 1.000000e+00 : f32
    %194 = vector.broadcast %cst_45 : f32 to vector<8x128xf32>
    %195 = arith.addf %194, %193 : vector<8x128xf32>
    %196 = arith.divf %194, %195 : vector<8x128xf32>
    %197 = math.tanh %191 : vector<8x128xf32>
    %198 = vector.extract_strided_slice %196 {offsets = [0, 0], sizes = [8, 32], strides = [1, 1]} : vector<8x128xf32> to vector<8x32xf32>
    %199 = vector.extract_strided_slice %196 {offsets = [0, 32], sizes = [8, 32], strides = [1, 1]} : vector<8x128xf32> to vector<8x32xf32>
    %200 = vector.extract_strided_slice %196 {offsets = [0, 96], sizes = [8, 32], strides = [1, 1]} : vector<8x128xf32> to vector<8x32xf32>
    %201 = vector.extract_strided_slice %197 {offsets = [0, 64], sizes = [8, 32], strides = [1, 1]} : vector<8x128xf32> to vector<8x32xf32>
    %202 = arith.mulf %199, %166 : vector<8x32xf32>
    %203 = arith.mulf %198, %201 : vector<8x32xf32>
    %204 = arith.addf %202, %203 : vector<8x32xf32>
    %205 = math.tanh %204 : vector<8x32xf32>
    %206 = arith.mulf %200, %205 : vector<8x32xf32>
    %c32 = arith.constant 32 : index
    %c0_46 = arith.constant 0 : index
    %207 = vector.load %arg10[%c32, %c0_46] : memref<64x32xf32, #tpu.memory_space<vmem>>, vector<8x32xf32>
    tpu.vector_store %arg10[%c32, %c0_46], %206 {strides = array<i32>} : memref<64x32xf32, #tpu.memory_space<vmem>>, vector<8x32xf32>,
    %208 = vector.extract_strided_slice %7 {offsets = [40, 0], sizes = [8, 128], strides = [1, 1]} : vector<64x128xf32> to vector<8x128xf32>
    %cst_47 = arith.constant dense<0.000000e+00> : vector<8x128xf32>
    %209 = tpu.matmul %187, %8, %cst_47 {dimension_numbers = #tpu.dot_dimension_numbers<[1], [0], [0], [1], [0, 0, 1, 1], [], []>} : vector<8x32xf32>, vector<32x128xf32>, vector<8x128xf32> -> vector<8x128xf32>
    %210 = arith.addf %208, %209 : vector<8x128xf32>
    %211 = arith.negf %210 : vector<8x128xf32>
    %212 = math.exp %211 : vector<8x128xf32>
    %cst_48 = arith.constant 1.000000e+00 : f32
    %213 = vector.broadcast %cst_48 : f32 to vector<8x128xf32>
    %214 = arith.addf %213, %212 : vector<8x128xf32>
    %215 = arith.divf %213, %214 : vector<8x128xf32>
    %216 = math.tanh %210 : vector<8x128xf32>
    %217 = vector.extract_strided_slice %215 {offsets = [0, 0], sizes = [8, 32], strides = [1, 1]} : vector<8x128xf32> to vector<8x32xf32>
    %218 = vector.extract_strided_slice %215 {offsets = [0, 32], sizes = [8, 32], strides = [1, 1]} : vector<8x128xf32> to vector<8x32xf32>
    %219 = vector.extract_strided_slice %215 {offsets = [0, 96], sizes = [8, 32], strides = [1, 1]} : vector<8x128xf32> to vector<8x32xf32>
    %220 = vector.extract_strided_slice %216 {offsets = [0, 64], sizes = [8, 32], strides = [1, 1]} : vector<8x128xf32> to vector<8x32xf32>
    %221 = arith.mulf %218, %185 : vector<8x32xf32>
    %222 = arith.mulf %217, %220 : vector<8x32xf32>
    %223 = arith.addf %221, %222 : vector<8x32xf32>
    %224 = math.tanh %223 : vector<8x32xf32>
    %225 = arith.mulf %219, %224 : vector<8x32xf32>
    %cst_49 = arith.constant dense<0.000000e+00> : vector<8x128xf32>
    %226 = tpu.matmul %206, %10, %cst_49 {dimension_numbers = #tpu.dot_dimension_numbers<[1], [0], [0], [1], [0, 0, 1, 1], [], []>} : vector<8x32xf32>, vector<32x128xf32>, vector<8x128xf32> -> vector<8x128xf32>
    %227 = arith.addf %226, %13 : vector<8x128xf32>
    %cst_50 = arith.constant dense<0.000000e+00> : vector<8x128xf32>
    %228 = tpu.matmul %225, %9, %cst_50 {dimension_numbers = #tpu.dot_dimension_numbers<[1], [0], [0], [1], [0, 0, 1, 1], [], []>} : vector<8x32xf32>, vector<32x128xf32>, vector<8x128xf32> -> vector<8x128xf32>
    %229 = arith.addf %228, %227 : vector<8x128xf32>
    %230 = arith.negf %229 : vector<8x128xf32>
    %231 = math.exp %230 : vector<8x128xf32>
    %cst_51 = arith.constant 1.000000e+00 : f32
    %232 = vector.broadcast %cst_51 : f32 to vector<8x128xf32>
    %233 = arith.addf %232, %231 : vector<8x128xf32>
    %234 = arith.divf %232, %233 : vector<8x128xf32>
    %235 = math.tanh %229 : vector<8x128xf32>
    %236 = vector.extract_strided_slice %234 {offsets = [0, 0], sizes = [8, 32], strides = [1, 1]} : vector<8x128xf32> to vector<8x32xf32>
    %237 = vector.extract_strided_slice %234 {offsets = [0, 32], sizes = [8, 32], strides = [1, 1]} : vector<8x128xf32> to vector<8x32xf32>
    %238 = vector.extract_strided_slice %234 {offsets = [0, 96], sizes = [8, 32], strides = [1, 1]} : vector<8x128xf32> to vector<8x32xf32>
    %239 = vector.extract_strided_slice %235 {offsets = [0, 64], sizes = [8, 32], strides = [1, 1]} : vector<8x128xf32> to vector<8x32xf32>
    %240 = arith.mulf %237, %204 : vector<8x32xf32>
    %241 = arith.mulf %236, %239 : vector<8x32xf32>
    %242 = arith.addf %240, %241 : vector<8x32xf32>
    %243 = math.tanh %242 : vector<8x32xf32>
    %244 = arith.mulf %238, %243 : vector<8x32xf32>
    %c40 = arith.constant 40 : index
    %c0_52 = arith.constant 0 : index
    %245 = vector.load %arg10[%c40, %c0_52] : memref<64x32xf32, #tpu.memory_space<vmem>>, vector<8x32xf32>
    tpu.vector_store %arg10[%c40, %c0_52], %244 {strides = array<i32>} : memref<64x32xf32, #tpu.memory_space<vmem>>, vector<8x32xf32>,
    %246 = vector.extract_strided_slice %7 {offsets = [48, 0], sizes = [8, 128], strides = [1, 1]} : vector<64x128xf32> to vector<8x128xf32>
    %cst_53 = arith.constant dense<0.000000e+00> : vector<8x128xf32>
    %247 = tpu.matmul %225, %8, %cst_53 {dimension_numbers = #tpu.dot_dimension_numbers<[1], [0], [0], [1], [0, 0, 1, 1], [], []>} : vector<8x32xf32>, vector<32x128xf32>, vector<8x128xf32> -> vector<8x128xf32>
    %248 = arith.addf %246, %247 : vector<8x128xf32>
    %249 = arith.negf %248 : vector<8x128xf32>
    %250 = math.exp %249 : vector<8x128xf32>
    %cst_54 = arith.constant 1.000000e+00 : f32
    %251 = vector.broadcast %cst_54 : f32 to vector<8x128xf32>
    %252 = arith.addf %251, %250 : vector<8x128xf32>
    %253 = arith.divf %251, %252 : vector<8x128xf32>
    %254 = math.tanh %248 : vector<8x128xf32>
    %255 = vector.extract_strided_slice %253 {offsets = [0, 0], sizes = [8, 32], strides = [1, 1]} : vector<8x128xf32> to vector<8x32xf32>
    %256 = vector.extract_strided_slice %253 {offsets = [0, 32], sizes = [8, 32], strides = [1, 1]} : vector<8x128xf32> to vector<8x32xf32>
    %257 = vector.extract_strided_slice %253 {offsets = [0, 96], sizes = [8, 32], strides = [1, 1]} : vector<8x128xf32> to vector<8x32xf32>
    %258 = vector.extract_strided_slice %254 {offsets = [0, 64], sizes = [8, 32], strides = [1, 1]} : vector<8x128xf32> to vector<8x32xf32>
    %259 = arith.mulf %256, %223 : vector<8x32xf32>
    %260 = arith.mulf %255, %258 : vector<8x32xf32>
    %261 = arith.addf %259, %260 : vector<8x32xf32>
    %262 = math.tanh %261 : vector<8x32xf32>
    %263 = arith.mulf %257, %262 : vector<8x32xf32>
    %cst_55 = arith.constant dense<0.000000e+00> : vector<8x128xf32>
    %264 = tpu.matmul %244, %10, %cst_55 {dimension_numbers = #tpu.dot_dimension_numbers<[1], [0], [0], [1], [0, 0, 1, 1], [], []>} : vector<8x32xf32>, vector<32x128xf32>, vector<8x128xf32> -> vector<8x128xf32>
    %265 = arith.addf %264, %13 : vector<8x128xf32>
    %cst_56 = arith.constant dense<0.000000e+00> : vector<8x128xf32>
    %266 = tpu.matmul %263, %9, %cst_56 {dimension_numbers = #tpu.dot_dimension_numbers<[1], [0], [0], [1], [0, 0, 1, 1], [], []>} : vector<8x32xf32>, vector<32x128xf32>, vector<8x128xf32> -> vector<8x128xf32>
    %267 = arith.addf %266, %265 : vector<8x128xf32>
    %268 = arith.negf %267 : vector<8x128xf32>
    %269 = math.exp %268 : vector<8x128xf32>
    %cst_57 = arith.constant 1.000000e+00 : f32
    %270 = vector.broadcast %cst_57 : f32 to vector<8x128xf32>
    %271 = arith.addf %270, %269 : vector<8x128xf32>
    %272 = arith.divf %270, %271 : vector<8x128xf32>
    %273 = math.tanh %267 : vector<8x128xf32>
    %274 = vector.extract_strided_slice %272 {offsets = [0, 0], sizes = [8, 32], strides = [1, 1]} : vector<8x128xf32> to vector<8x32xf32>
    %275 = vector.extract_strided_slice %272 {offsets = [0, 32], sizes = [8, 32], strides = [1, 1]} : vector<8x128xf32> to vector<8x32xf32>
    %276 = vector.extract_strided_slice %272 {offsets = [0, 96], sizes = [8, 32], strides = [1, 1]} : vector<8x128xf32> to vector<8x32xf32>
    %277 = vector.extract_strided_slice %273 {offsets = [0, 64], sizes = [8, 32], strides = [1, 1]} : vector<8x128xf32> to vector<8x32xf32>
    %278 = arith.mulf %275, %242 : vector<8x32xf32>
    %279 = arith.mulf %274, %277 : vector<8x32xf32>
    %280 = arith.addf %278, %279 : vector<8x32xf32>
    %281 = math.tanh %280 : vector<8x32xf32>
    %282 = arith.mulf %276, %281 : vector<8x32xf32>
    %c48 = arith.constant 48 : index
    %c0_58 = arith.constant 0 : index
    %283 = vector.load %arg10[%c48, %c0_58] : memref<64x32xf32, #tpu.memory_space<vmem>>, vector<8x32xf32>
    tpu.vector_store %arg10[%c48, %c0_58], %282 {strides = array<i32>} : memref<64x32xf32, #tpu.memory_space<vmem>>, vector<8x32xf32>,
    %284 = vector.extract_strided_slice %7 {offsets = [56, 0], sizes = [8, 128], strides = [1, 1]} : vector<64x128xf32> to vector<8x128xf32>
    %cst_59 = arith.constant dense<0.000000e+00> : vector<8x128xf32>
    %285 = tpu.matmul %263, %8, %cst_59 {dimension_numbers = #tpu.dot_dimension_numbers<[1], [0], [0], [1], [0, 0, 1, 1], [], []>} : vector<8x32xf32>, vector<32x128xf32>, vector<8x128xf32> -> vector<8x128xf32>
    %286 = arith.addf %284, %285 : vector<8x128xf32>
    %287 = arith.negf %286 : vector<8x128xf32>
    %288 = math.exp %287 : vector<8x128xf32>
    %cst_60 = arith.constant 1.000000e+00 : f32
    %289 = vector.broadcast %cst_60 : f32 to vector<8x128xf32>
    %290 = arith.addf %289, %288 : vector<8x128xf32>
    %291 = arith.divf %289, %290 : vector<8x128xf32>
    %292 = math.tanh %286 : vector<8x128xf32>
    %293 = vector.extract_strided_slice %291 {offsets = [0, 0], sizes = [8, 32], strides = [1, 1]} : vector<8x128xf32> to vector<8x32xf32>
    %294 = vector.extract_strided_slice %291 {offsets = [0, 32], sizes = [8, 32], strides = [1, 1]} : vector<8x128xf32> to vector<8x32xf32>
    %295 = vector.extract_strided_slice %291 {offsets = [0, 96], sizes = [8, 32], strides = [1, 1]} : vector<8x128xf32> to vector<8x32xf32>
    %296 = vector.extract_strided_slice %292 {offsets = [0, 64], sizes = [8, 32], strides = [1, 1]} : vector<8x128xf32> to vector<8x32xf32>
    %297 = arith.mulf %294, %261 : vector<8x32xf32>
    %298 = arith.mulf %293, %296 : vector<8x32xf32>
    %299 = arith.addf %297, %298 : vector<8x32xf32>
    %300 = math.tanh %299 : vector<8x32xf32>
    %301 = arith.mulf %295, %300 : vector<8x32xf32>
    %cst_61 = arith.constant dense<0.000000e+00> : vector<8x128xf32>
    %302 = tpu.matmul %282, %10, %cst_61 {dimension_numbers = #tpu.dot_dimension_numbers<[1], [0], [0], [1], [0, 0, 1, 1], [], []>} : vector<8x32xf32>, vector<32x128xf32>, vector<8x128xf32> -> vector<8x128xf32>
    %303 = arith.addf %302, %13 : vector<8x128xf32>
    %cst_62 = arith.constant dense<0.000000e+00> : vector<8x128xf32>
    %304 = tpu.matmul %301, %9, %cst_62 {dimension_numbers = #tpu.dot_dimension_numbers<[1], [0], [0], [1], [0, 0, 1, 1], [], []>} : vector<8x32xf32>, vector<32x128xf32>, vector<8x128xf32> -> vector<8x128xf32>
    %305 = arith.addf %304, %303 : vector<8x128xf32>
    %306 = arith.negf %305 : vector<8x128xf32>
    %307 = math.exp %306 : vector<8x128xf32>
    %cst_63 = arith.constant 1.000000e+00 : f32
    %308 = vector.broadcast %cst_63 : f32 to vector<8x128xf32>
    %309 = arith.addf %308, %307 : vector<8x128xf32>
    %310 = arith.divf %308, %309 : vector<8x128xf32>
    %311 = math.tanh %305 : vector<8x128xf32>
    %312 = vector.extract_strided_slice %310 {offsets = [0, 0], sizes = [8, 32], strides = [1, 1]} : vector<8x128xf32> to vector<8x32xf32>
    %313 = vector.extract_strided_slice %310 {offsets = [0, 32], sizes = [8, 32], strides = [1, 1]} : vector<8x128xf32> to vector<8x32xf32>
    %314 = vector.extract_strided_slice %310 {offsets = [0, 96], sizes = [8, 32], strides = [1, 1]} : vector<8x128xf32> to vector<8x32xf32>
    %315 = vector.extract_strided_slice %311 {offsets = [0, 64], sizes = [8, 32], strides = [1, 1]} : vector<8x128xf32> to vector<8x32xf32>
    %316 = arith.mulf %313, %280 : vector<8x32xf32>
    %317 = arith.mulf %312, %315 : vector<8x32xf32>
    %318 = arith.addf %316, %317 : vector<8x32xf32>
    %319 = math.tanh %318 : vector<8x32xf32>
    %320 = arith.mulf %314, %319 : vector<8x32xf32>
    %c56 = arith.constant 56 : index
    %c0_64 = arith.constant 0 : index
    %321 = vector.load %arg10[%c56, %c0_64] : memref<64x32xf32, #tpu.memory_space<vmem>>, vector<8x32xf32>
    tpu.vector_store %arg10[%c56, %c0_64], %320 {strides = array<i32>} : memref<64x32xf32, #tpu.memory_space<vmem>>, vector<8x32xf32>,
    %c0_65 = arith.constant 0 : index
    %c0_66 = arith.constant 0 : index
    %322 = vector.load %arg10[%c0_65, %c0_66] : memref<64x32xf32, #tpu.memory_space<vmem>>, vector<64x32xf32>
    %c0_67 = arith.constant 0 : index
    %c0_68 = arith.constant 0 : index
    %323 = vector.load %arg7[%c0_67, %c0_68] : memref<1x32xf32, #tpu.memory_space<vmem>>, vector<1x32xf32>
    %324 = vector.broadcast %323 : vector<1x32xf32> to vector<64x32xf32>
    %325 = arith.mulf %322, %324 : vector<64x32xf32>
    %cst_69 = arith.constant dense<0.000000e+00> : vector<64xf32>
    %326 = vector.multi_reduction <add>, %325, %cst_69 [1] : vector<64x32xf32> to vector<64xf32>
    %327 = vector.shape_cast %326 : vector<64xf32> to vector<64x1xf32>
    %c0_70 = arith.constant 0 : index
    %c0_71 = arith.constant 0 : index
    %328 = vector.load %arg8[%c0_70, %c0_71] : memref<1x1xf32, #tpu.memory_space<vmem>>, vector<1x1xf32>
    %329 = vector.broadcast %328 : vector<1x1xf32> to vector<64x1xf32>
    %330 = arith.addf %327, %329 : vector<64x1xf32>
    %c0_72 = arith.constant 0 : index
    %c0_73 = arith.constant 0 : index
    %331 = vector.load %arg9[%c0_72, %c0_73] : memref<64x1xf32, #tpu.memory_space<vmem>>, vector<64x1xf32>
    tpu.vector_store %arg9[%c0_72, %c0_73], %330 {strides = array<i32>} : memref<64x1xf32, #tpu.memory_space<vmem>>, vector<64x1xf32>,
    return
  }
}

</mosaic_0001>

<bundles_post_ra>
// kernel: tpu_custom_call.1
= control target key start
LH: loop header
LB: loop body
LE: loop exit
PB: predicated region body
PF: predicated region fallthrough
CT: control target
= control target key end

     0   :  { %s3657_s0 = inlined_call_operand.vmem [shape: f32[64,1], index: 0, kind: input, shape index: {}]   ;;  %s3658_s1 = inlined_call_operand.vmem [shape: f32[1,128], index: 1, kind: input, shape index: {}]   ;;  %s3659_s2 = inlined_call_operand.vmem [shape: f32[1,128], index: 2, kind: input, shape index: {}]   ;;  %s3660_s3 = inlined_call_operand.vmem [shape: f32[32,128], index: 3, kind: input, shape index: {}]   ;;  %s3661_s4 = inlined_call_operand.vmem [shape: f32[32,128], index: 4, kind: input, shape index: {}]   ;;  %s3662_s5 = inlined_call_operand.hbm [shape: f32[32,128], index: 5, kind: input, shape index: {}]   ;;  %s3663_s6 = inlined_call_operand.vmem [shape: f32[1,128], index: 6, kind: input, shape index: {}]   ;;  %s3664_s7 = inlined_call_operand.vmem [shape: f32[1,32], index: 7, kind: input, shape index: {}]   ;;  %s3665_s8 = inlined_call_operand.<no memory space> [shape: f32[1,1], index: 8, kind: input, shape index: {}]   ;;  %s3666_s9 = inlined_call_operand.vmem [shape: f32[64,1], index: 9, kind: output, shape index: {}]  }
   0x1   :  { %v14_v0 = vstv %s3665_s8 }
   0x2   :  { %15 = vst [vmem:[#allocation3] sm:$0x1] %v14_v0 }
   0x3   :  { %16 = vsyncpa [#allocation5], 0  ;;  %s3149_s11 = smov [#allocation4]   ;;  %s3125_s15 = scalar_lea.hbm %s3662_s5, 512 }
   0x4   :  { %s32_s12 = sshll.u32 %s3149_s11, 4  ;;  %p3126_p0 = scmp.ne.s32.totalorder %s3662_s5, %s3125_s15  ;;  %s33_s12 = int_to_ptr.vmem [resolvable:$true] %s32_s12 }
   0x5   :  { %p3129_p1 = scmp.lt.u32.totalorder %s3125_s15, %s3662_s5 }
   0x7   :  { %p3131_p2 = pnand %p3129_p1, %p3126_p0 }
   0x9   :  { %3134 = shalt.err (!%p3131_p2)
}
   0xa   :  { %s3135_s8 = scalar_lea.vmem %s33_s12, 512  ;;  %p3140_p4 = scmp.lt.s32.totalorder %s33_s12, %s33_s12 }
   0xb   :  { %p3136_p3 = scmp.ne.s32.totalorder %s33_s12, %s3135_s8  ;;  %p3141_p5 = scmp.lt.s32.totalorder %s3135_s8, %s3135_s8 }
   0xd   :  { %p3142_p6 = por %p3141_p5, %p3140_p4 }
   0xf   :  { %p3143_p7 = pnand %p3142_p6, %p3136_p3 }
  0x11   :  { %3146 = shalt.err (!%p3143_p7)
}
  0x12   :  { %s3150_s20 = smov 128   ;;  %s3151_s21 = smov 8  }
  0x13   :  { %38 = dma.hbm_to_vmem [thread:$0]  %s3662_s5, 512, %s33_s12, [#allocation5], %s3150_s20, %s3150_s20, %s3151_s21  }
  0x14   :  { %3147 = dma.done.wait [#allocation5], 512  }
  0x15   :  { %3148 = vsyncadd [#allocation5], 4294966784  ;;  %v3152_v1 = vmov 0.0|0.0   ;;  %vm3153_vm0 = vmmov 0   ;;  %v3154_v2 = vmov 0.0   ;;  %v3155_v3 = vmov 0  }
  0x16   :  { %2818 = vmatprep.subr.bf16.mxu1 %v3152_v1  ;;  %2562 = vmatprep.mubr.msk.f32.mxu1 %vm3153_vm0, %v3154_v2  ;;  %v126_v4 = vld [vmem:[%s3660_s3] sm:$0xff]  ;;  %v127_v5 = vld [vmem:[%s3660_s3 + $0x8] sm:$0xff]  ;;  %v128_v6 = vld [vmem:[%s3660_s3 + $0x10] sm:$0xff]  ;;  %s3156_s15 = smov 64   ;;  %vm145_vm1 = vcmask 261120   ;;  %vm2377_vm2 = vcmask 7168  }
  0x17   :  { %2995 = vset.pattern.permute.xlu0 %v3155_v3  ;;  %2836 = vmatprep.subr.bf16.mxu0 %v3152_v1  ;;  %v3238_v7 = vpack.c.bf16 %v127_v5, %v126_v4  ;;  %v129_v8 = vld [vmem:[%s3660_s3 + $0x18] sm:$0xff]  ;;  %v48_v9 = vld [vmem:[%s3657_s0] sm:$0xff]  ;;  %v135_v30 = vld [vmem:[#allocation4 + $0x8] sm:$0xff] }
  0x18   :  { %2595 = vmatprep.mubr.msk.f32.mxu0 %vm3153_vm0, %v3154_v2  ;;  %2996 = vset.pattern.permute.xlu1 %v3155_v3  ;;  %v3247_v10 = vpack.c.bf16 %v129_v8, %v128_v6  ;;  %v3262_v11 = vld [vmem:[%s3658_s1] ss:$0 sm:$0xff]  ;;  %s3157_s1 = smov 32   ;;  %v134_v29 = vld [vmem:[#allocation4] sm:$0xff]  ;;  %v136_v31 = vld [vmem:[#allocation4 + $0x10] sm:$0xff] }
  0x19   :  { %59 = vperm.xlu0 %2995, %v48_v9   ;;  %2820 = vmatpush3.bf16.msra.mxu1 %v3238_v7  ;;  %v3268_v14 = vld [vmem:[%s3659_s2] ss:$0 sm:$0xff]  ;;  %v3276_v32 = vpack.c.bf16 %v135_v30, %v134_v29  ;;  %v131_v36 = vld [vmem:[%s3661_s4 + $0x8] sm:$0xff]  ;;  %v132_v38 = vld [vmem:[%s3661_s4 + $0x10] sm:$0xff] }
  0x1a   :  { %2838 = vmatpush3.bf16.msra.mxu0 %v3238_v7  ;;  %2821 = vmatprep.subr.bf16.mxu1 %v3152_v1  ;;  %v137_v33 = vld [vmem:[#allocation4 + $0x18] sm:$0xff]  ;;  %v49_v42 = vld [vmem:[%s3657_s0 + $0x8] sm:$0xff] }
  0x1b   :  { %2839 = vmatprep.subr.bf16.mxu0 %v3152_v1  ;;  %v3279_v34 = vpack.c.bf16 %v137_v33, %v136_v31  ;;  %v130_v35 = vld [vmem:[%s3661_s4] sm:$0xff]  ;;  %v133_v39 = vld [vmem:[%s3661_s4 + $0x18] sm:$0xff] }
  0x1c   :  { %v3289_v37 = vpack.c.bf16 %v131_v36, %v130_v35  ;;  %v3301_v41 = vpack.c.bf16 %v133_v39, %v132_v38  ;;  %v3331_v49 = vld [vmem:[%s3663_s6] ss:$0 sm:$0xff] }
  0x1d   :  { %2823 = vmatpush3.bf16.msra.mxu1 %v3247_v10 }
  0x1e   :  { %2841 = vmatpush3.bf16.msra.mxu0 %v3247_v10  ;;  %2824 = vmatprep.subr.bf16.mxu1 %v3152_v1 }
  0x1f   :  { %2842 = vmatprep.subr.bf16.mxu0 %v3152_v1 }
  0x20   :  { %2563 = vmatmul.mubr.f32.vlgmr.msra.gmra.mrb[0].mxu1 %v3154_v2 }
  0x21   :  { %2573 = vmatprep.mubr.msk.f32.mxu1 %vm3153_vm0, %v3154_v2  ;;  %2826 = vmatpush3.bf16.msra.mxu1 %v3276_v32 }
  0x22   :  { %2827 = vmatprep.subr.bf16.mxu1 %v3152_v1 }
  0x25   :  { %2829 = vmatpush3.bf16.msra.mxu1 %v3279_v34 }
  0x26   :  { %2830 = vmatprep.subr.bf16.mxu1 %v3152_v1 }
  0x28   :  { %2574 = vmatmul.mubr.f32.vlgmr.msra.gmra.mrb[2].mxu1 %v3154_v2 }
  0x29   :  { %2832 = vmatpush3.bf16.msra.mxu1 %v3289_v37  ;;  %2584 = vmatprep.mubr.msk.f32.mxu1 %vm3153_vm0, %v3154_v2 }
  0x2a   :  { %2833 = vmatprep.subr.bf16.mxu1 %v3152_v1 }
  0x2d   :  { %2835 = vmatpush3.bf16.msra.mxu1 %v3301_v41 }
  0x2e   :  { %2854 = vmatprep.subr.bf16.mxu1 %v3152_v1 }
  0x98   :  { %v60_v12 = vpop.permute.xlu0 %59 }
  0x99   :  { %v103_v13 = vmul.f32 %v3262_v11, %v60_v12 }
  0x9b   :  { %v118_v15 = vadd.f32 %v3268_v14, %v103_v13 }
  0xf3   :  { %v215_v16 = vpop.f32.mrb[0].mxu1 }
  0xf4   :  { %v219_v17 = vadd.f32 %v215_v16, %v118_v15  ;;  %v2564_v18 = vpop.f32.mrb[1].mxu1 }
  0xf6   :  { %2997 = vtanh.f32 %v219_v17  ;;  %v2394_v20 = vmul.f32 -1.442695, %v219_v17 }
  0xf8   :  { %2999 = vpow2.f32 %v2394_v20 }
 0x100   :  { %v2998_v19 = vpop.eup %2997 }
 0x101   :  { %229 = vrot.lane.b32.xlu0 %v2998_v19, %s3156_s15 }
 0x102   :  { %v3000_v21 = vpop.eup %2999 }
 0x103   :  { %v223_v22 = vadd.f32 1.0, %v3000_v21 }
 0x105   :  { %3001 = vrcp.f32 %v223_v22 }
 0x10f   :  { %v3002_v23 = vpop.eup %3001 }
 0x110   :  { %v227_v26 = vmul.f32 0.0, %v3002_v23 }
 0x173   :  { %v230_v24 = vpop.permute.xlu0 %229 }
 0x174   :  { %v232_v25 = vmul.f32 %v3002_v23, %v230_v24  ;;  %v50_v24 = vld [vmem:[%s3657_s0 + $0x10] sm:$0xff] }
 0x176   :  { %234 = vrot.lane.b32.xlu1 %v232_v25, %s3157_s1 }
 0x1e8   :  { %v235_v27 = vpop.permute.xlu1 %234 }
 0x1e9   :  { %v3273_v28 = vadd.f32 %v235_v27, %v227_v26 }
 0x1eb   :  { %3003 = vtanh.f32 %v3273_v28 }
 0x1f5   :  { %v3004_v40 = vpop.eup %3003 }
 0x1f6   :  { %240 = vrot.lane.b32.xlu1 %v3004_v40, %s3156_s15 }
 0x1fa   :  { %64 = vperm.xlu1 %2996, %v49_v42  }
 0x268   :  { %v241_v43 = vpop.permute.xlu1 %240 }
 0x269   :  { %v243_v44 = vmul.f32 %v3002_v23, %v241_v43 }
 0x26b   :  { %315 = vrot.lane.b32.xlu0 %v243_v44, %s3157_s1 }
 0x279   :  { %v65_v46 = vpop.permute.xlu1 %64 }
 0x27a   :  { %v104_v47 = vmul.f32 %v3262_v11, %v65_v46 }
 0x27c   :  { %v119_v48 = vadd.f32 %v3268_v14, %v104_v47 }
 0x2dd   :  { %v316_v45 = vpop.permute.xlu0 %315 }
 0x2de   :  { %2585 = vmatmul.mubr.msk.f32.vlgmr.msra.gmra.mrb[2].mxu1 %vm145_vm1, %v316_v45  ;;  %2596 = vmatmul.mubr.msk.f32.vlgmr.msra.gmra.mrb[0].mxu0 %vm145_vm1, %v316_v45 }
 0x2df   :  { %2844 = vmatpush3.bf16.msra.mxu0 %v3276_v32  ;;  %2856 = vmatpush3.bf16.msra.mxu1 %v3238_v7 }
 0x2e0   :  { %2845 = vmatprep.subr.bf16.mxu0 %v3152_v1  ;;  %2857 = vmatprep.subr.bf16.mxu1 %v3152_v1 }
 0x2e1   :  { %2606 = vmatprep.mubr.msk.f32.mxu0 %vm3153_vm0, %v3154_v2  ;;  %2628 = vmatprep.mubr.msk.f32.mxu1 %vm3153_vm0, %v3154_v2 }
 0x2e3   :  { %2847 = vmatpush3.bf16.msra.mxu0 %v3279_v34  ;;  %2859 = vmatpush3.bf16.msra.mxu1 %v3247_v10 }
 0x2e4   :  { %2848 = vmatprep.subr.bf16.mxu0 %v3152_v1  ;;  %2860 = vmatprep.subr.bf16.mxu1 %v3152_v1 }
 0x3b1   :  { %v385_v50 = vpop.f32.mrb[2].mxu1  ;;  %v484_v51 = vpop.f32.mrb[0].mxu0 }
 0x3b2   :  { %v2962_v52 = vadd.f32 %v3331_v49, %v385_v50  ;;  %v488_v53 = vadd.f32 %v484_v51, %v119_v48  ;;  %v2586_v54 = vpop.f32.mrb[3].mxu1  ;;  %v2597_v55 = vpop.f32.mrb[1].mxu0 }
 0x3b4   :  { %3005 = vtanh.f32 %v2962_v52  ;;  %v2396_v58 = vmul.f32 -1.442695, %v2962_v52  ;;  %v2398_v59 = vmul.f32 -1.442695, %v488_v53 }
 0x3b5   :  { %3007 = vtanh.f32 %v488_v53 }
 0x3b6   :  { %3009 = vpow2.f32 %v2396_v58 }
 0x3b7   :  { %3011 = vpow2.f32 %v2398_v59 }
 0x3be   :  { %v3006_v56 = vpop.eup %3005 }
 0x3bf   :  { %v3008_v57 = vpop.eup %3007  ;;  %398 = vrot.lane.b32.xlu0 %v3006_v56, %s3156_s15 }
 0x3c0   :  { %498 = vrot.lane.b32.xlu1 %v3008_v57, %s3156_s15  ;;  %v3010_v60 = vpop.eup %3009 }
 0x3c1   :  { %v3012_v61 = vpop.eup %3011  ;;  %v392_v62 = vadd.f32 1.0, %v3010_v60 }
 0x3c2   :  { %v492_v63 = vadd.f32 1.0, %v3012_v61 }
 0x3c3   :  { %3013 = vrcp.f32 %v392_v62 }
 0x3c4   :  { %3015 = vrcp.f32 %v492_v63 }
 0x3cd   :  { %v3014_v0 = vpop.eup %3013 }
 0x3ce   :  { %v3016_v4 = vpop.eup %3015  ;;  %v396_v9 = vmul.f32 0.0, %v3014_v0 }
 0x3cf   :  { %v496_v13 = vmul.f32 %v3016_v4, %v3273_v28 }
 0x431   :  { %v399_v3 = vpop.permute.xlu0 %398 }
 0x432   :  { %v401_v5 = vmul.f32 %v3014_v0, %v399_v3  ;;  %v499_v6 = vpop.permute.xlu1 %498 }
 0x433   :  { %v501_v8 = vmul.f32 %v3016_v4, %v499_v6 }
 0x434   :  { %403 = vrot.lane.b32.xlu0 %v401_v5, %s3157_s1  ;;  %v51_v5 = vld [vmem:[%s3657_s0 + $0x18] sm:$0xff] }
 0x435   :  { %503 = vrot.lane.b32.xlu1 %v501_v8, %s3157_s1 }
 0x4a6   :  { %v404_v12 = vpop.permute.xlu0 %403 }
 0x4a7   :  { %v3339_v15 = vadd.f32 %v404_v12, %v396_v9  ;;  %v504_v16 = vpop.permute.xlu1 %503 }
 0x4a8   :  { %v3341_v17 = vadd.f32 %v504_v16, %v496_v13 }
 0x4a9   :  { %3017 = vtanh.f32 %v3339_v15 }
 0x4aa   :  { %3019 = vtanh.f32 %v3341_v17 }
 0x4b3   :  { %v3018_v18 = vpop.eup %3017 }
 0x4b4   :  { %v3020_v19 = vpop.eup %3019  ;;  %409 = vrot.lane.b32.xlu0 %v3018_v18, %s3156_s15 }
 0x4b5   :  { %509 = vrot.lane.b32.xlu1 %v3020_v19, %s3156_s15 }
 0x526   :  { %v410_v20 = vpop.permute.xlu0 %409 }
 0x527   :  { %v412_v21 = vmul.f32 %v3014_v0, %v410_v20  ;;  %v510_v22 = vpop.permute.xlu1 %509 }
 0x528   :  { %v512_v23 = vmul.f32 %v3016_v4, %v510_v22 }
 0x529   :  { %414 = vrot.lane.b32.xlu0 %v412_v21, %s3157_s1 }
 0x52a   :  { %586 = vrot.lane.b32.xlu1 %v512_v23, %s3157_s1 }
 0x52d   :  { %69 = vperm.xlu0 %2995, %v50_v24  }
 0x59b   :  { %v415_v25 = vpop.permute.xlu0 %414 }
 0x59c   :  { %417 = vst.msk [vmem:[#allocation2] sm:$0xff] %vm145_vm1, %v415_v25  ;;  %v587_v26 = vpop.permute.xlu1 %586  ;;  %2607 = vmatmul.mubr.msk.f32.vlgmr.msra.gmra.mrb[2].mxu0 %vm145_vm1, %v415_v25 }
 0x59d   :  { %2850 = vmatpush3.bf16.msra.mxu0 %v3289_v37  ;;  %2629 = vmatmul.mubr.msk.f32.vlgmr.msra.gmra.mrb[4].mxu1 %vm145_vm1, %v587_v26 }
 0x59e   :  { %2851 = vmatprep.subr.bf16.mxu0 %v3152_v1  ;;  %2617 = vmatprep.mubr.msk.f32.mxu0 %vm3153_vm0, %v3154_v2 }
 0x59f   :  { %2862 = vmatpush3.bf16.msra.mxu1 %v3276_v32  ;;  %2639 = vmatprep.mubr.msk.f32.mxu1 %vm3153_vm0, %v3154_v2 }
 0x5a0   :  { %2863 = vmatprep.subr.bf16.mxu1 %v3152_v1 }
 0x5a1   :  { %2853 = vmatpush3.bf16.msra.mxu0 %v3301_v41 }
 0x5a2   :  { %2872 = vmatprep.subr.bf16.mxu0 %v3152_v1 }
 0x5a3   :  { %2865 = vmatpush3.bf16.msra.mxu1 %v3279_v34 }
 0x5a4   :  { %2618 = vmatmul.mubr.msk.f32.vlgmr.msra.gmra.mrb[2].mxu0 %vm145_vm1, %v587_v26  ;;  %2866 = vmatprep.subr.bf16.mxu1 %v3152_v1 }
 0x5a5   :  { %2874 = vmatpush3.bf16.msra.mxu0 %v3238_v7  ;;  %2661 = vmatprep.mubr.msk.f32.mxu0 %vm3153_vm0, %v3154_v2 }
 0x5a6   :  { %2875 = vmatprep.subr.bf16.mxu0 %v3152_v1 }
 0x5a9   :  { %2877 = vmatpush3.bf16.msra.mxu0 %v3247_v10 }
 0x5aa   :  { %2878 = vmatprep.subr.bf16.mxu0 %v3152_v1 }
 0x5ac   :  { %v70_v27 = vpop.permute.xlu0 %69 }
 0x5ad   :  { %v105_v28 = vmul.f32 %v3262_v11, %v70_v27 }
 0x5af   :  { %v120_v29 = vadd.f32 %v3268_v14, %v105_v28 }
 0x670   :  { %v755_v30 = vpop.f32.mrb[4].mxu1 }
 0x671   :  { %v759_v31 = vadd.f32 %v755_v30, %v120_v29  ;;  %v2630_v33 = vpop.f32.mrb[5].mxu1 }
 0x673   :  { %3021 = vtanh.f32 %v759_v31  ;;  %v2403_v42 = vmul.f32 -1.442695, %v759_v31 }
 0x677   :  { %v656_v35 = vpop.f32.mrb[2].mxu0 }
 0x678   :  { %v2963_v36 = vadd.f32 %v3331_v49, %v656_v35  ;;  %v2619_v38 = vpop.f32.mrb[3].mxu0 }
 0x67a   :  { %3023 = vtanh.f32 %v2963_v36  ;;  %v2401_v43 = vmul.f32 -1.442695, %v2963_v36 }
 0x67b   :  { %3025 = vpow2.f32 %v2403_v42 }
 0x67c   :  { %3027 = vpow2.f32 %v2401_v43 }
 0x67d   :  { %v3022_v39 = vpop.eup %3021 }
 0x67e   :  { %769 = vrot.lane.b32.xlu0 %v3022_v39, %s3156_s15 }
 0x684   :  { %v3024_v40 = vpop.eup %3023 }
 0x685   :  { %669 = vrot.lane.b32.xlu1 %v3024_v40, %s3156_s15  ;;  %v3026_v44 = vpop.eup %3025 }
 0x686   :  { %v763_v45 = vadd.f32 1.0, %v3026_v44  ;;  %v3028_v46 = vpop.eup %3027 }
 0x687   :  { %v663_v47 = vadd.f32 1.0, %v3028_v46 }
 0x688   :  { %3029 = vrcp.f32 %v763_v45 }
 0x689   :  { %3031 = vrcp.f32 %v663_v47 }
 0x692   :  { %v3030_v48 = vpop.eup %3029 }
 0x693   :  { %v3032_v52 = vpop.eup %3031  ;;  %v767_v55 = vmul.f32 %v3030_v48, %v3341_v17 }
 0x694   :  { %v667_v58 = vmul.f32 %v3032_v52, %v3339_v15 }
 0x6f0   :  { %v770_v50 = vpop.permute.xlu0 %769 }
 0x6f1   :  { %v772_v51 = vmul.f32 %v3030_v48, %v770_v50 }
 0x6f3   :  { %774 = vrot.lane.b32.xlu0 %v772_v51, %s3157_s1 }
 0x6f7   :  { %v670_v53 = vpop.permute.xlu1 %669 }
 0x6f8   :  { %v672_v54 = vmul.f32 %v3032_v52, %v670_v53 }
 0x6fa   :  { %674 = vrot.lane.b32.xlu1 %v672_v54, %s3157_s1 }
 0x765   :  { %v775_v56 = vpop.permute.xlu0 %774 }
 0x766   :  { %v3382_v57 = vadd.f32 %v775_v56, %v767_v55 }
 0x768   :  { %3033 = vtanh.f32 %v3382_v57 }
 0x76c   :  { %v675_v59 = vpop.permute.xlu1 %674 }
 0x76d   :  { %v3386_v60 = vadd.f32 %v675_v59, %v667_v58 }
 0x76f   :  { %3035 = vtanh.f32 %v3386_v60 }
 0x772   :  { %v3034_v61 = vpop.eup %3033 }
 0x773   :  { %780 = vrot.lane.b32.xlu0 %v3034_v61, %s3156_s15 }
 0x779   :  { %v3036_v62 = vpop.eup %3035 }
 0x77a   :  { %680 = vrot.lane.b32.xlu1 %v3036_v62, %s3156_s15 }
 0x7e5   :  { %v781_v63 = vpop.permute.xlu0 %780 }
 0x7e6   :  { %v783_v0 = vmul.f32 %v3030_v48, %v781_v63 }
 0x7e8   :  { %857 = vrot.lane.b32.xlu0 %v783_v0, %s3157_s1 }
 0x7ec   :  { %v681_v3 = vpop.permute.xlu1 %680 }
 0x7ed   :  { %v683_v4 = vmul.f32 %v3032_v52, %v681_v3  ;;  %v52_v52 = vld [vmem:[%s3657_s0 + $0x20] sm:$0xff] }
 0x7ef   :  { %685 = vrot.lane.b32.xlu1 %v683_v4, %s3157_s1 }
 0x7f3   :  { %74 = vperm.xlu1 %2996, %v51_v5  }
 0x85a   :  { %v858_v6 = vpop.permute.xlu0 %857 }
 0x85b   :  { %2662 = vmatmul.mubr.msk.f32.vlgmr.msra.gmra.mrb[4].mxu0 %vm145_vm1, %v858_v6 }
 0x85c   :  { %2880 = vmatpush3.bf16.msra.mxu0 %v3276_v32  ;;  %2672 = vmatprep.mubr.msk.f32.mxu0 %vm3153_vm0, %v3154_v2 }
 0x85d   :  { %2881 = vmatprep.subr.bf16.mxu0 %v3152_v1 }
 0x860   :  { %2883 = vmatpush3.bf16.msra.mxu0 %v3279_v34 }
 0x861   :  { %v686_v8 = vpop.permute.xlu1 %685  ;;  %2884 = vmatprep.subr.bf16.mxu0 %v3152_v1 }
 0x862   :  { %688 = vst.msk [vmem:[#allocation2 + $0x8] sm:$0xff] %vm145_vm1, %v686_v8  ;;  %2640 = vmatmul.mubr.msk.f32.vlgmr.msra.gmra.mrb[6].mxu1 %vm145_vm1, %v686_v8 }
 0x863   :  { %2868 = vmatpush3.bf16.msra.mxu1 %v3289_v37  ;;  %2650 = vmatprep.mubr.msk.f32.mxu1 %vm3153_vm0, %v3154_v2 }
 0x864   :  { %2869 = vmatprep.subr.bf16.mxu1 %v3152_v1 }
 0x867   :  { %2871 = vmatpush3.bf16.msra.mxu1 %v3301_v41 }
 0x868   :  { %2890 = vmatprep.subr.bf16.mxu1 %v3152_v1 }
 0x86a   :  { %2651 = vmatmul.mubr.msk.f32.vlgmr.msra.gmra.mrb[6].mxu1 %vm145_vm1, %v858_v6 }
 0x86b   :  { %2892 = vmatpush3.bf16.msra.mxu1 %v3238_v7  ;;  %2694 = vmatprep.mubr.msk.f32.mxu1 %vm3153_vm0, %v3154_v2 }
 0x86c   :  { %2893 = vmatprep.subr.bf16.mxu1 %v3152_v1 }
 0x86f   :  { %2895 = vmatpush3.bf16.msra.mxu1 %v3247_v10 }
 0x870   :  { %2896 = vmatprep.subr.bf16.mxu1 %v3152_v1 }
 0x872   :  { %v75_v9 = vpop.permute.xlu1 %74 }
 0x873   :  { %v106_v12 = vmul.f32 %v3262_v11, %v75_v9 }
 0x875   :  { %v121_v13 = vadd.f32 %v3268_v14, %v106_v12 }
 0x92e   :  { %v1026_v15 = vpop.f32.mrb[4].mxu0 }
 0x92f   :  { %v1030_v16 = vadd.f32 %v1026_v15, %v121_v13  ;;  %v2663_v17 = vpop.f32.mrb[5].mxu0 }
 0x931   :  { %3037 = vtanh.f32 %v1030_v16  ;;  %v2408_v23 = vmul.f32 -1.442695, %v1030_v16 }
 0x93b   :  { %v3038_v18 = vpop.eup %3037 }
 0x93c   :  { %1040 = vrot.lane.b32.xlu1 %v3038_v18, %s3156_s15 }
 0x93d   :  { %v927_v19 = vpop.f32.mrb[6].mxu1 }
 0x93e   :  { %v2964_v20 = vadd.f32 %v3331_v49, %v927_v19  ;;  %v2652_v21 = vpop.f32.mrb[7].mxu1 }
 0x940   :  { %3039 = vtanh.f32 %v2964_v20  ;;  %v2406_v25 = vmul.f32 -1.442695, %v2964_v20 }
 0x941   :  { %3041 = vpow2.f32 %v2408_v23 }
 0x942   :  { %3043 = vpow2.f32 %v2406_v25 }
 0x94a   :  { %v3040_v22 = vpop.eup %3039 }
 0x94b   :  { %940 = vrot.lane.b32.xlu0 %v3040_v22, %s3156_s15  ;;  %v3042_v24 = vpop.eup %3041 }
 0x94c   :  { %v1034_v26 = vadd.f32 1.0, %v3042_v24  ;;  %v3044_v27 = vpop.eup %3043 }
 0x94d   :  { %v934_v31 = vadd.f32 1.0, %v3044_v27 }
 0x94e   :  { %3045 = vrcp.f32 %v1034_v26 }
 0x94f   :  { %3047 = vrcp.f32 %v934_v31 }
 0x958   :  { %v3046_v28 = vpop.eup %3045 }
 0x959   :  { %v3048_v33 = vpop.eup %3047  ;;  %v1038_v38 = vmul.f32 %v3046_v28, %v3382_v57 }
 0x95a   :  { %v938_v43 = vmul.f32 %v3048_v33, %v3386_v60 }
 0x9ae   :  { %v1041_v29 = vpop.permute.xlu1 %1040 }
 0x9af   :  { %v1043_v30 = vmul.f32 %v3046_v28, %v1041_v29 }
 0x9b1   :  { %1045 = vrot.lane.b32.xlu1 %v1043_v30, %s3157_s1 }
 0x9bd   :  { %v941_v35 = vpop.permute.xlu0 %940 }
 0x9be   :  { %v943_v36 = vmul.f32 %v3048_v33, %v941_v35 }
 0x9c0   :  { %945 = vrot.lane.b32.xlu0 %v943_v36, %s3157_s1 }
 0xa23   :  { %v1046_v39 = vpop.permute.xlu1 %1045 }
 0xa24   :  { %v3426_v40 = vadd.f32 %v1046_v39, %v1038_v38 }
 0xa26   :  { %3049 = vtanh.f32 %v3426_v40 }
 0xa30   :  { %v3050_v42 = vpop.eup %3049 }
 0xa31   :  { %1051 = vrot.lane.b32.xlu1 %v3050_v42, %s3156_s15 }
 0xa32   :  { %v946_v44 = vpop.permute.xlu0 %945 }
 0xa33   :  { %v3431_v45 = vadd.f32 %v946_v44, %v938_v43 }
 0xa35   :  { %3051 = vtanh.f32 %v3431_v45 }
 0xa3f   :  { %v3052_v46 = vpop.eup %3051 }
 0xa40   :  { %951 = vrot.lane.b32.xlu0 %v3052_v46, %s3156_s15 }
 0xaa3   :  { %v1052_v47 = vpop.permute.xlu1 %1051 }
 0xaa4   :  { %v1054_v48 = vmul.f32 %v3046_v28, %v1052_v47 }
 0xaa6   :  { %1128 = vrot.lane.b32.xlu1 %v1054_v48, %s3157_s1 }
 0xab2   :  { %v952_v50 = vpop.permute.xlu0 %951 }
 0xab3   :  { %v954_v51 = vmul.f32 %v3048_v33, %v952_v50  ;;  %v53_v33 = vld [vmem:[%s3657_s0 + $0x28] sm:$0xff] }
 0xab5   :  { %956 = vrot.lane.b32.xlu0 %v954_v51, %s3157_s1 }
 0xab9   :  { %79 = vperm.xlu0 %2995, %v52_v52  }
 0xb18   :  { %v1129_v53 = vpop.permute.xlu1 %1128 }
 0xb19   :  { %2695 = vmatmul.mubr.msk.f32.vlgmr.msra.gmra.mrb[8].mxu1 %vm145_vm1, %v1129_v53 }
 0xb1a   :  { %2898 = vmatpush3.bf16.msra.mxu1 %v3276_v32  ;;  %2705 = vmatprep.mubr.msk.f32.mxu1 %vm3153_vm0, %v3154_v2 }
 0xb1b   :  { %2899 = vmatprep.subr.bf16.mxu1 %v3152_v1 }
 0xb1e   :  { %2901 = vmatpush3.bf16.msra.mxu1 %v3279_v34 }
 0xb1f   :  { %2902 = vmatprep.subr.bf16.mxu1 %v3152_v1 }
 0xb27   :  { %v957_v54 = vpop.permute.xlu0 %956 }
 0xb28   :  { %959 = vst.msk [vmem:[#allocation2 + $0x10] sm:$0xff] %vm145_vm1, %v957_v54  ;;  %2673 = vmatmul.mubr.msk.f32.vlgmr.msra.gmra.mrb[6].mxu0 %vm145_vm1, %v957_v54 }
 0xb29   :  { %2886 = vmatpush3.bf16.msra.mxu0 %v3289_v37  ;;  %2683 = vmatprep.mubr.msk.f32.mxu0 %vm3153_vm0, %v3154_v2 }
 0xb2a   :  { %2887 = vmatprep.subr.bf16.mxu0 %v3152_v1 }
 0xb2d   :  { %2889 = vmatpush3.bf16.msra.mxu0 %v3301_v41 }
 0xb2e   :  { %2908 = vmatprep.subr.bf16.mxu0 %v3152_v1 }
 0xb30   :  { %2684 = vmatmul.mubr.msk.f32.vlgmr.msra.gmra.mrb[6].mxu0 %vm145_vm1, %v1129_v53 }
 0xb31   :  { %2910 = vmatpush3.bf16.msra.mxu0 %v3238_v7  ;;  %2727 = vmatprep.mubr.msk.f32.mxu0 %vm3153_vm0, %v3154_v2 }
 0xb32   :  { %2911 = vmatprep.subr.bf16.mxu0 %v3152_v1 }
 0xb35   :  { %2913 = vmatpush3.bf16.msra.mxu0 %v3247_v10 }
 0xb36   :  { %2914 = vmatprep.subr.bf16.mxu0 %v3152_v1 }
 0xb38   :  { %v80_v55 = vpop.permute.xlu0 %79 }
 0xb39   :  { %v107_v56 = vmul.f32 %v3262_v11, %v80_v55 }
 0xb3b   :  { %v122_v57 = vadd.f32 %v3268_v14, %v107_v56 }
 0xbec   :  { %v1297_v58 = vpop.f32.mrb[8].mxu1 }
 0xbed   :  { %v1301_v59 = vadd.f32 %v1297_v58, %v122_v57  ;;  %v2696_v60 = vpop.f32.mrb[9].mxu1 }
 0xbef   :  { %3053 = vtanh.f32 %v1301_v59  ;;  %v2413_v4 = vmul.f32 -1.442695, %v1301_v59 }
 0xbf9   :  { %v3054_v61 = vpop.eup %3053 }
 0xbfa   :  { %1311 = vrot.lane.b32.xlu0 %v3054_v61, %s3156_s15 }
 0xc03   :  { %v1198_v62 = vpop.f32.mrb[6].mxu0 }
 0xc04   :  { %v2965_v63 = vadd.f32 %v3331_v49, %v1198_v62  ;;  %v2685_v0 = vpop.f32.mrb[7].mxu0 }
 0xc06   :  { %3055 = vtanh.f32 %v2965_v63  ;;  %v2411_v8 = vmul.f32 -1.442695, %v2965_v63 }
 0xc07   :  { %3057 = vpow2.f32 %v2413_v4 }
 0xc10   :  { %v3056_v3 = vpop.eup %3055 }
 0xc11   :  { %1211 = vrot.lane.b32.xlu1 %v3056_v3, %s3156_s15  ;;  %v3058_v5 = vpop.eup %3057 }
 0xc12   :  { %v1305_v6 = vadd.f32 1.0, %v3058_v5 }
 0xc14   :  { %3059 = vrcp.f32 %v1305_v6 }
 0xc15   :  { %3061 = vpow2.f32 %v2411_v8 }
 0xc1e   :  { %v3060_v9 = vpop.eup %3059 }
 0xc1f   :  { %v3062_v15 = vpop.eup %3061  ;;  %v1309_v20 = vmul.f32 %v3060_v9, %v3426_v40 }
 0xc20   :  { %v1205_v16 = vadd.f32 1.0, %v3062_v15 }
 0xc22   :  { %3063 = vrcp.f32 %v1205_v16 }
 0xc2c   :  { %v3064_v17 = vpop.eup %3063 }
 0xc2d   :  { %v1209_v24 = vmul.f32 %v3064_v17, %v3431_v45 }
 0xc6c   :  { %v1312_v12 = vpop.permute.xlu0 %1311 }
 0xc6d   :  { %v1314_v13 = vmul.f32 %v3060_v9, %v1312_v12 }
 0xc6f   :  { %1316 = vrot.lane.b32.xlu0 %v1314_v13, %s3157_s1 }
 0xc83   :  { %v1212_v18 = vpop.permute.xlu1 %1211 }
 0xc84   :  { %v1214_v19 = vmul.f32 %v3064_v17, %v1212_v18 }
 0xc86   :  { %1216 = vrot.lane.b32.xlu1 %v1214_v19, %s3157_s1 }
 0xce1   :  { %v1317_v21 = vpop.permute.xlu0 %1316 }
 0xce2   :  { %v3470_v22 = vadd.f32 %v1317_v21, %v1309_v20 }
 0xce4   :  { %3065 = vtanh.f32 %v3470_v22 }
 0xcee   :  { %v3066_v23 = vpop.eup %3065 }
 0xcef   :  { %1322 = vrot.lane.b32.xlu0 %v3066_v23, %s3156_s15 }
 0xcf8   :  { %v1217_v25 = vpop.permute.xlu1 %1216 }
 0xcf9   :  { %v3475_v26 = vadd.f32 %v1217_v25, %v1209_v24 }
 0xcfb   :  { %3067 = vtanh.f32 %v3475_v26 }
 0xd05   :  { %v3068_v27 = vpop.eup %3067 }
 0xd06   :  { %1222 = vrot.lane.b32.xlu1 %v3068_v27, %s3156_s15 }
 0xd61   :  { %v1323_v28 = vpop.permute.xlu0 %1322 }
 0xd62   :  { %v1325_v29 = vmul.f32 %v3060_v9, %v1323_v28 }
 0xd64   :  { %1399 = vrot.lane.b32.xlu0 %v1325_v29, %s3157_s1 }
 0xd78   :  { %v1223_v30 = vpop.permute.xlu1 %1222 }
 0xd79   :  { %v1225_v31 = vmul.f32 %v3064_v17, %v1223_v30  ;;  %v54_v17 = vld [vmem:[%s3657_s0 + $0x30] sm:$0xff] }
 0xd7b   :  { %1227 = vrot.lane.b32.xlu1 %v1225_v31, %s3157_s1 }
 0xd7f   :  { %84 = vperm.xlu1 %2996, %v53_v33  }
 0xdd6   :  { %v1400_v35 = vpop.permute.xlu0 %1399 }
 0xdd7   :  { %2728 = vmatmul.mubr.msk.f32.vlgmr.msra.gmra.mrb[8].mxu0 %vm145_vm1, %v1400_v35 }
 0xdd8   :  { %2916 = vmatpush3.bf16.msra.mxu0 %v3276_v32  ;;  %2738 = vmatprep.mubr.msk.f32.mxu0 %vm3153_vm0, %v3154_v2 }
 0xdd9   :  { %2917 = vmatprep.subr.bf16.mxu0 %v3152_v1 }
 0xddc   :  { %2919 = vmatpush3.bf16.msra.mxu0 %v3279_v34 }
 0xddd   :  { %2920 = vmatprep.subr.bf16.mxu0 %v3152_v1 }
 0xded   :  { %v1228_v36 = vpop.permute.xlu1 %1227 }
 0xdee   :  { %1230 = vst.msk [vmem:[#allocation2 + $0x18] sm:$0xff] %vm145_vm1, %v1228_v36  ;;  %2706 = vmatmul.mubr.msk.f32.vlgmr.msra.gmra.mrb[10].mxu1 %vm145_vm1, %v1228_v36 }
 0xdef   :  { %2904 = vmatpush3.bf16.msra.mxu1 %v3289_v37  ;;  %2716 = vmatprep.mubr.msk.f32.mxu1 %vm3153_vm0, %v3154_v2 }
 0xdf0   :  { %2905 = vmatprep.subr.bf16.mxu1 %v3152_v1 }
 0xdf3   :  { %2907 = vmatpush3.bf16.msra.mxu1 %v3301_v41 }
 0xdf4   :  { %2926 = vmatprep.subr.bf16.mxu1 %v3152_v1 }
 0xdf6   :  { %2717 = vmatmul.mubr.msk.f32.vlgmr.msra.gmra.mrb[10].mxu1 %vm145_vm1, %v1400_v35 }
 0xdf7   :  { %2928 = vmatpush3.bf16.msra.mxu1 %v3238_v7  ;;  %2760 = vmatprep.mubr.msk.f32.mxu1 %vm3153_vm0, %v3154_v2 }
 0xdf8   :  { %2929 = vmatprep.subr.bf16.mxu1 %v3152_v1 }
 0xdfb   :  { %2931 = vmatpush3.bf16.msra.mxu1 %v3247_v10 }
 0xdfc   :  { %2932 = vmatprep.subr.bf16.mxu1 %v3152_v1 }
 0xdfe   :  { %v85_v38 = vpop.permute.xlu1 %84 }
 0xdff   :  { %v108_v39 = vmul.f32 %v3262_v11, %v85_v38 }
 0xe01   :  { %v123_v40 = vadd.f32 %v3268_v14, %v108_v39 }
 0xeaa   :  { %v1568_v42 = vpop.f32.mrb[8].mxu0 }
 0xeab   :  { %v1572_v43 = vadd.f32 %v1568_v42, %v123_v40  ;;  %v2729_v44 = vpop.f32.mrb[9].mxu0 }
 0xead   :  { %3069 = vtanh.f32 %v1572_v43  ;;  %v2418_v51 = vmul.f32 -1.442695, %v1572_v43 }
 0xeb7   :  { %v3070_v45 = vpop.eup %3069 }
 0xeb8   :  { %1582 = vrot.lane.b32.xlu1 %v3070_v45, %s3156_s15 }
 0xec9   :  { %v1469_v46 = vpop.f32.mrb[10].mxu1 }
 0xeca   :  { %v2966_v47 = vadd.f32 %v3331_v49, %v1469_v46  ;;  %v2718_v48 = vpop.f32.mrb[11].mxu1 }
 0xecc   :  { %3071 = vtanh.f32 %v2966_v47  ;;  %v2416_v56 = vmul.f32 -1.442695, %v2966_v47 }
 0xecd   :  { %3073 = vpow2.f32 %v2418_v51 }
 0xed6   :  { %v3072_v50 = vpop.eup %3071 }
 0xed7   :  { %1482 = vrot.lane.b32.xlu0 %v3072_v50, %s3156_s15  ;;  %v3074_v52 = vpop.eup %3073 }
 0xed8   :  { %v1576_v53 = vadd.f32 1.0, %v3074_v52 }
 0xeda   :  { %3075 = vrcp.f32 %v1576_v53 }
 0xedb   :  { %3077 = vpow2.f32 %v2416_v56 }
 0xee4   :  { %v3076_v54 = vpop.eup %3075 }
 0xee5   :  { %v3078_v58 = vpop.eup %3077  ;;  %v1580_v63 = vmul.f32 %v3076_v54, %v3470_v22 }
 0xee6   :  { %v1476_v59 = vadd.f32 1.0, %v3078_v58  ;;  %v55_v58 = vld [vmem:[%s3657_s0 + $0x38] sm:$0xff] }
 0xee8   :  { %3079 = vrcp.f32 %v1476_v59 }
 0xef2   :  { %v3080_v60 = vpop.eup %3079 }
 0xef3   :  { %v1480_v5 = vmul.f32 %v3080_v60, %v3475_v26 }
 0xf2a   :  { %v1583_v55 = vpop.permute.xlu1 %1582 }
 0xf2b   :  { %v1585_v57 = vmul.f32 %v3076_v54, %v1583_v55 }
 0xf2d   :  { %1587 = vrot.lane.b32.xlu1 %v1585_v57, %s3157_s1 }
 0xf49   :  { %v1483_v61 = vpop.permute.xlu0 %1482 }
 0xf4a   :  { %v1485_v62 = vmul.f32 %v3080_v60, %v1483_v61 }
 0xf4c   :  { %1487 = vrot.lane.b32.xlu0 %v1485_v62, %s3157_s1 }
 0xf9f   :  { %v1588_v0 = vpop.permute.xlu1 %1587 }
 0xfa0   :  { %v3514_v3 = vadd.f32 %v1588_v0, %v1580_v63 }
 0xfa2   :  { %3081 = vtanh.f32 %v3514_v3 }
 0xfac   :  { %v3082_v4 = vpop.eup %3081 }
 0xfad   :  { %1593 = vrot.lane.b32.xlu1 %v3082_v4, %s3156_s15 }
 0xfbe   :  { %v1488_v6 = vpop.permute.xlu0 %1487 }
 0xfbf   :  { %v3519_v8 = vadd.f32 %v1488_v6, %v1480_v5 }
 0xfc1   :  { %3083 = vtanh.f32 %v3519_v8 }
 0xfcb   :  { %v3084_v9 = vpop.eup %3083 }
 0xfcc   :  { %1493 = vrot.lane.b32.xlu0 %v3084_v9, %s3156_s15 }
0x101f   :  { %v1594_v12 = vpop.permute.xlu1 %1593 }
0x1020   :  { %v1596_v13 = vmul.f32 %v3076_v54, %v1594_v12 }
0x1022   :  { %1670 = vrot.lane.b32.xlu1 %v1596_v13, %s3157_s1 }
0x103e   :  { %v1494_v15 = vpop.permute.xlu0 %1493 }
0x103f   :  { %v1496_v16 = vmul.f32 %v3080_v60, %v1494_v15 }
0x1041   :  { %1498 = vrot.lane.b32.xlu0 %v1496_v16, %s3157_s1 }
0x1045   :  { %89 = vperm.xlu0 %2995, %v54_v17  }
0x1094   :  { %v1671_v18 = vpop.permute.xlu1 %1670 }
0x1095   :  { %2761 = vmatmul.mubr.msk.f32.vlgmr.msra.gmra.mrb[12].mxu1 %vm145_vm1, %v1671_v18 }
0x1096   :  { %2934 = vmatpush3.bf16.msra.mxu1 %v3276_v32  ;;  %2771 = vmatprep.mubr.msk.f32.mxu1 %vm3153_vm0, %v3154_v2 }
0x1097   :  { %2935 = vmatprep.subr.bf16.mxu1 %v3152_v1 }
0x109a   :  { %2937 = vmatpush3.bf16.msra.mxu1 %v3279_v34 }
0x109b   :  { %2938 = vmatprep.subr.bf16.mxu1 %v3152_v1 }
0x10b3   :  { %v1499_v19 = vpop.permute.xlu0 %1498 }
0x10b4   :  { %1501 = vst.msk [vmem:[#allocation2 + $0x20] sm:$0xff] %vm145_vm1, %v1499_v19  ;;  %2739 = vmatmul.mubr.msk.f32.vlgmr.msra.gmra.mrb[10].mxu0 %vm145_vm1, %v1499_v19 }
0x10b5   :  { %2922 = vmatpush3.bf16.msra.mxu0 %v3289_v37  ;;  %2749 = vmatprep.mubr.msk.f32.mxu0 %vm3153_vm0, %v3154_v2 }
0x10b6   :  { %2923 = vmatprep.subr.bf16.mxu0 %v3152_v1 }
0x10b9   :  { %2925 = vmatpush3.bf16.msra.mxu0 %v3301_v41 }
0x10ba   :  { %2944 = vmatprep.subr.bf16.mxu0 %v3152_v1 }
0x10bc   :  { %2750 = vmatmul.mubr.msk.f32.vlgmr.msra.gmra.mrb[10].mxu0 %vm145_vm1, %v1671_v18 }
0x10bd   :  { %2946 = vmatpush3.bf16.msra.mxu0 %v3238_v7  ;;  %2793 = vmatprep.mubr.msk.f32.mxu0 %vm3153_vm0, %v3154_v2 }
0x10be   :  { %2947 = vmatprep.subr.bf16.mxu0 %v3152_v1 }
0x10c1   :  { %2949 = vmatpush3.bf16.msra.mxu0 %v3247_v10 }
0x10c2   :  { %2950 = vmatprep.subr.bf16.mxu0 %v3152_v1 }
0x10c4   :  { %v90_v20 = vpop.permute.xlu0 %89 }
0x10c5   :  { %v109_v21 = vmul.f32 %v3262_v11, %v90_v20 }
0x10c7   :  { %v124_v22 = vadd.f32 %v3268_v14, %v109_v21 }
0x1168   :  { %v1839_v23 = vpop.f32.mrb[12].mxu1 }
0x1169   :  { %v1843_v24 = vadd.f32 %v1839_v23, %v124_v22  ;;  %v2762_v25 = vpop.f32.mrb[13].mxu1 }
0x116b   :  { %3085 = vtanh.f32 %v1843_v24  ;;  %v2423_v29 = vmul.f32 -1.442695, %v1843_v24 }
0x1175   :  { %v3086_v26 = vpop.eup %3085 }
0x1176   :  { %1853 = vrot.lane.b32.xlu0 %v3086_v26, %s3156_s15 }
0x118f   :  { %v1740_v7 = vpop.f32.mrb[10].mxu0 }
0x1190   :  { %v2967_v27 = vadd.f32 %v3331_v49, %v1740_v7  ;;  %v2751_v28 = vpop.f32.mrb[11].mxu0 }
0x1192   :  { %3087 = vtanh.f32 %v2967_v27  ;;  %v2421_v38 = vmul.f32 -1.442695, %v2967_v27 }
0x1193   :  { %3089 = vpow2.f32 %v2423_v29 }
0x119c   :  { %v3088_v10 = vpop.eup %3087 }
0x119d   :  { %1753 = vrot.lane.b32.xlu1 %v3088_v10, %s3156_s15  ;;  %v3090_v30 = vpop.eup %3089 }
0x119e   :  { %v1847_v31 = vadd.f32 1.0, %v3090_v30 }
0x11a0   :  { %3091 = vrcp.f32 %v1847_v31 }
0x11a1   :  { %3093 = vpow2.f32 %v2421_v38 }
0x11aa   :  { %v3092_v33 = vpop.eup %3091 }
0x11ab   :  { %v3094_v39 = vpop.eup %3093  ;;  %v1851_v45 = vmul.f32 %v3092_v33, %v3514_v3 }
0x11ac   :  { %v1747_v40 = vadd.f32 1.0, %v3094_v39 }
0x11ae   :  { %3095 = vrcp.f32 %v1747_v40 }
0x11b8   :  { %v3096_v42 = vpop.eup %3095 }
0x11b9   :  { %v1751_v50 = vmul.f32 %v3096_v42, %v3519_v8 }
0x11e8   :  { %v1854_v35 = vpop.permute.xlu0 %1853 }
0x11e9   :  { %v1856_v36 = vmul.f32 %v3092_v33, %v1854_v35 }
0x11eb   :  { %1858 = vrot.lane.b32.xlu0 %v1856_v36, %s3157_s1 }
0x120f   :  { %v1754_v43 = vpop.permute.xlu1 %1753 }
0x1210   :  { %v1756_v44 = vmul.f32 %v3096_v42, %v1754_v43 }
0x1212   :  { %1758 = vrot.lane.b32.xlu1 %v1756_v44, %s3157_s1 }
0x125d   :  { %v1859_v46 = vpop.permute.xlu0 %1858 }
0x125e   :  { %v3558_v47 = vadd.f32 %v1859_v46, %v1851_v45 }
0x1260   :  { %3097 = vtanh.f32 %v3558_v47 }
0x126a   :  { %v3098_v48 = vpop.eup %3097 }
0x126b   :  { %1864 = vrot.lane.b32.xlu0 %v3098_v48, %s3156_s15  ;;  %v2432_v48 = vld [vmem:[%s3664_s7] ss:$0 sm:$0xff] }
0x1284   :  { %v1759_v51 = vpop.permute.xlu1 %1758 }
0x1285   :  { %v3563_v52 = vadd.f32 %v1759_v51, %v1751_v50  ;;  %v2317_v51 = vld [vmem:[#allocation2 + $0x10] sm:$0xff] }
0x1287   :  { %3099 = vtanh.f32 %v3563_v52 }
0x1291   :  { %v3100_v53 = vpop.eup %3099 }
0x1292   :  { %1764 = vrot.lane.b32.xlu1 %v3100_v53, %s3156_s15  ;;  %v2332_v53 = vmul.f32 %v2432_v48, %v2317_v51 }
0x12dd   :  { %v1865_v54 = vpop.permute.xlu0 %1864 }
0x12de   :  { %v1867_v55 = vmul.f32 %v3092_v33, %v1865_v54  ;;  %v2318_v54 = vld [vmem:[#allocation2 + $0x18] sm:$0xff] }
0x12e0   :  { %1941 = vrot.lane.b32.xlu0 %v1867_v55, %s3157_s1  ;;  %v2344_v55 = vsel %vm145_vm1, %v2332_v53, 0.0 }
0x1304   :  { %v1765_v56 = vpop.permute.xlu1 %1764 }
0x1305   :  { %v1767_v57 = vmul.f32 %v3096_v42, %v1765_v56  ;;  %v2333_v56 = vmul.f32 %v2432_v48, %v2318_v54 }
0x1307   :  { %1769 = vrot.lane.b32.xlu1 %v1767_v57, %s3157_s1 }
0x130b   :  { %94 = vperm.xlu1 %2996, %v55_v58   ;;  %v2347_v58 = vsel %vm145_vm1, %v2333_v56, 0.0 }
0x1352   :  { %v1942_v59 = vpop.permute.xlu0 %1941 }
0x1353   :  { %2794 = vmatmul.mubr.msk.f32.vlgmr.msra.gmra.mrb[12].mxu0 %vm145_vm1, %v1942_v59 }
0x1354   :  { %2952 = vmatpush3.bf16.msra.mxu0 %v3276_v32  ;;  %2804 = vmatprep.mubr.msk.f32.mxu0 %vm3153_vm0, %v3154_v2 }
0x1355   :  { %2953 = vmatprep.subr.bf16.mxu0 %v3152_v1 }
0x1358   :  { %2955 = vmatpush3.bf16.msra.mxu0 %v3279_v34 }
0x1359   :  { %2956 = vmatprep.subr.bf16.mxu0 %v3152_v1 }
0x1379   :  { %v1770_v60 = vpop.permute.xlu1 %1769 }
0x137a   :  { %1772 = vst.msk [vmem:[#allocation2 + $0x28] sm:$0xff] %vm145_vm1, %v1770_v60  ;;  %2772 = vmatmul.mubr.msk.f32.vlgmr.msra.gmra.mrb[14].mxu1 %vm145_vm1, %v1770_v60 }
0x137b   :  { %2940 = vmatpush3.bf16.msra.mxu1 %v3289_v37  ;;  %2782 = vmatprep.mubr.msk.f32.mxu1 %vm3153_vm0, %v3154_v2 }
0x137c   :  { %2941 = vmatprep.subr.bf16.mxu1 %v3152_v1 }
0x137f   :  { %2943 = vmatpush3.bf16.msra.mxu1 %v3301_v41 }
0x1381   :  { %v2320_v57 = vld [vmem:[#allocation2 + $0x28] sm:$0xff] }
0x1382   :  { %2783 = vmatmul.mubr.msk.f32.vlgmr.msra.gmra.mrb[14].mxu1 %vm145_vm1, %v1942_v59  ;;  %v2335_v59 = vmul.f32 %v2432_v48, %v2320_v57 }
0x1384   :  { %v2353_v60 = vsel %vm145_vm1, %v2335_v59, 0.0 }
0x138a   :  { %v95_v32 = vpop.permute.xlu1 %94 }
0x138b   :  { %v110_v34 = vmul.f32 %v3262_v11, %v95_v32 }
0x138d   :  { %v125_v61 = vadd.f32 %v3268_v14, %v110_v34 }
0x1426   :  { %v2110_v62 = vpop.f32.mrb[12].mxu0 }
0x1427   :  { %v2114_v63 = vadd.f32 %v2110_v62, %v125_v61  ;;  %v2795_v0 = vpop.f32.mrb[13].mxu0  ;;  %v2316_v61 = vld [vmem:[#allocation2 + $0x8] sm:$0xff] }
0x1428   :  { %v2331_v62 = vmul.f32 %v2432_v48, %v2316_v61 }
0x1429   :  { %3101 = vtanh.f32 %v2114_v63  ;;  %v2428_v9 = vmul.f32 -1.442695, %v2114_v63  ;;  %v2319_v63 = vld [vmem:[#allocation2 + $0x20] sm:$0xff] }
0x142a   :  { %v2341_v0 = vsel %vm145_vm1, %v2331_v62, 0.0 }
0x1433   :  { %v3102_v3 = vpop.eup %3101 }
0x1434   :  { %2124 = vrot.lane.b32.xlu1 %v3102_v3, %s3156_s15  ;;  %v2334_v3 = vmul.f32 %v2432_v48, %v2319_v63 }
0x1455   :  { %v2011_v4 = vpop.f32.mrb[14].mxu1 }
0x1456   :  { %v2968_v5 = vadd.f32 %v3331_v49, %v2011_v4  ;;  %v2784_v6 = vpop.f32.mrb[15].mxu1 }
0x1458   :  { %3103 = vtanh.f32 %v2968_v5  ;;  %v2426_v16 = vmul.f32 -1.442695, %v2968_v5  ;;  %v2350_v5 = vsel %vm145_vm1, %v2334_v3, 0.0 }
0x1459   :  { %3105 = vpow2.f32 %v2428_v9  ;;  %v2433_v9 = vld [vmem:[#allocation3] ss:$0 sm:$0xff] }
0x1462   :  { %v3104_v8 = vpop.eup %3103 }
0x1463   :  { %2024 = vrot.lane.b32.xlu0 %v3104_v8, %s3156_s15  ;;  %v3106_v11 = vpop.eup %3105 }
0x1464   :  { %v2118_v12 = vadd.f32 1.0, %v3106_v11 }
0x1466   :  { %3107 = vrcp.f32 %v2118_v12 }
0x1467   :  { %3109 = vpow2.f32 %v2426_v16 }
0x1470   :  { %v3108_v14 = vpop.eup %3107 }
0x1471   :  { %v3110_v17 = vpop.eup %3109  ;;  %v2122_v22 = vmul.f32 %v3108_v14, %v3558_v47  ;;  %v2315_v47 = vld [vmem:[#allocation2] sm:$0xff] }
0x1472   :  { %v2018_v18 = vadd.f32 1.0, %v3110_v17  ;;  %v2330_v50 = vmul.f32 %v2432_v48, %v2315_v47 }
0x1474   :  { %3111 = vrcp.f32 %v2018_v18 }
0x147e   :  { %v3112_v19 = vpop.eup %3111 }
0x147f   :  { %v2022_v26 = vmul.f32 %v3112_v19, %v3563_v52  ;;  %v2338_v52 = vsel %vm145_vm1, %v2330_v50, 0.0 }
0x14a6   :  { %v2125_v13 = vpop.permute.xlu1 %2124 }
0x14a7   :  { %v2127_v15 = vmul.f32 %v3108_v14, %v2125_v13 }
0x14a9   :  { %2129 = vrot.lane.b32.xlu1 %v2127_v15, %s3157_s1 }
0x14d5   :  { %v2025_v20 = vpop.permute.xlu0 %2024 }
0x14d6   :  { %v2027_v21 = vmul.f32 %v3112_v19, %v2025_v20 }
0x14d8   :  { %2029 = vrot.lane.b32.xlu0 %v2027_v21, %s3157_s1 }
0x151b   :  { %v2130_v23 = vpop.permute.xlu1 %2129 }
0x151c   :  { %v2132_v24 = vadd.f32 %v2130_v23, %v2122_v22 }
0x151e   :  { %3113 = vtanh.f32 %v2132_v24 }
0x1528   :  { %v3114_v25 = vpop.eup %3113 }
0x1529   :  { %2135 = vrot.lane.b32.xlu1 %v3114_v25, %s3156_s15 }
0x154a   :  { %v2030_v7 = vpop.permute.xlu0 %2029 }
0x154b   :  { %v2032_v27 = vadd.f32 %v2030_v7, %v2022_v26 }
0x154d   :  { %3115 = vtanh.f32 %v2032_v27 }
0x1557   :  { %v3116_v28 = vpop.eup %3115 }
0x1558   :  { %2035 = vrot.lane.b32.xlu0 %v3116_v28, %s3156_s15 }
0x159b   :  { %v2136_v10 = vpop.permute.xlu1 %2135 }
0x159c   :  { %v2138_v29 = vmul.f32 %v3108_v14, %v2136_v10 }
0x159e   :  { %2212 = vrot.lane.b32.xlu1 %v2138_v29, %s3157_s1 }
0x15ca   :  { %v2036_v30 = vpop.permute.xlu0 %2035 }
0x15cb   :  { %v2038_v31 = vmul.f32 %v3112_v19, %v2036_v30 }
0x15cd   :  { %2040 = vrot.lane.b32.xlu0 %v2038_v31, %s3157_s1 }
0x1610   :  { %v2213_v35 = vpop.permute.xlu1 %2212 }
0x163f   :  { %v2041_v33 = vpop.permute.xlu0 %2040 }
0x1640   :  { %2043 = vst.msk [vmem:[#allocation2 + $0x30] sm:$0xff] %vm145_vm1, %v2041_v33  ;;  %2805 = vmatmul.mubr.msk.f32.vlgmr.msra.gmra.mrb[14].mxu0 %vm145_vm1, %v2041_v33 }
0x1641   :  { %2958 = vmatpush3.bf16.msra.mxu0 %v3289_v37  ;;  %2815 = vmatprep.mubr.msk.f32.mxu0 %vm3153_vm0, %v3154_v2 }
0x1642   :  { %2959 = vmatprep.subr.bf16.mxu0 %v3152_v1 }
0x1645   :  { %2961 = vmatpush3.bf16.msra.mxu0 %v3301_v41 }
0x1647   :  { %v2321_v4 = vld [vmem:[#allocation2 + $0x30] sm:$0xff] }
0x1648   :  { %2816 = vmatmul.mubr.msk.f32.vlgmr.msra.gmra.mrb[14].mxu0 %vm145_vm1, %v2213_v35  ;;  %v2336_v6 = vmul.f32 %v2432_v48, %v2321_v4 }
0x164a   :  { %v2356_v8 = vsel %vm145_vm1, %v2336_v6, 0.0 }
0x171b   :  { %v2282_v36 = vpop.f32.mrb[14].mxu0 }
0x171c   :  { %v2969_v38 = vadd.f32 %v3331_v49, %v2282_v36  ;;  %v2817_v39 = vpop.f32.mrb[15].mxu0 }
0x171e   :  { %3117 = vtanh.f32 %v2969_v38  ;;  %v2431_v42 = vmul.f32 -1.442695, %v2969_v38 }
0x1720   :  { %3119 = vpow2.f32 %v2431_v42 }
0x1728   :  { %v3118_v40 = vpop.eup %3117 }
0x1729   :  { %2295 = vrot.lane.b32.xlu0 %v3118_v40, %s3156_s15 }
0x172a   :  { %v3120_v37 = vpop.eup %3119 }
0x172b   :  { %v2289_v43 = vadd.f32 1.0, %v3120_v37 }
0x172d   :  { %3121 = vrcp.f32 %v2289_v43 }
0x1737   :  { %v3122_v2 = vpop.eup %3121 }
0x1738   :  { %v2293_v41 = vmul.f32 %v3122_v2, %v2032_v27 }
0x179b   :  { %v2296_v1 = vpop.permute.xlu0 %2295 }
0x179c   :  { %v2298_v44 = vmul.f32 %v3122_v2, %v2296_v1 }
0x179e   :  { %2300 = vrot.lane.b32.xlu1 %v2298_v44, %s3157_s1 }
0x1810   :  { %v2301_v45 = vpop.permute.xlu1 %2300 }
0x1811   :  { %v2303_v46 = vadd.f32 %v2301_v45, %v2293_v41 }
0x1813   :  { %3123 = vtanh.f32 %v2303_v46 }
0x181d   :  { %v3124_v49 = vpop.eup %3123 }
0x181e   :  { %2306 = vrot.lane.b32.xlu0 %v3124_v49, %s3156_s15 }
0x183d   :  { %2339 = vadd.xlane.f32.xlu0 %v2338_v52 }
0x1841   :  { %2345 = vadd.xlane.f32.xlu0 %v2344_v55 }
0x1845   :  { %2348 = vadd.xlane.f32.xlu0 %v2347_v58 }
0x1849   :  { %2354 = vadd.xlane.f32.xlu0 %v2353_v60 }
0x1890   :  { %v2307_v32 = vpop.permute.xlu0 %2306 }
0x1891   :  { %v2309_v34 = vmul.f32 %v3122_v2, %v2307_v32 }
0x1893   :  { %2311 = vrot.lane.b32.xlu1 %v2309_v34, %s3157_s1 }
0x18b7   :  { %2342 = vadd.xlane.f32.xlu1 %v2341_v0 }
0x18bb   :  { %2351 = vadd.xlane.f32.xlu1 %v2350_v5 }
0x18bf   :  { %2357 = vadd.xlane.f32.xlu1 %v2356_v8 }
0x18ca   :  { %v2340_v11 = vpop.xlane.xlu0 %2339 }
0x18cb   :  { %v2369_v12 = vadd.f32 %v2433_v9, %v2340_v11 }
0x18cd   :  { %2378 = vst.msk [vmem:[%s3666_s9] sm:$0xff] %vm2377_vm2, %v2369_v12 }
0x18ce   :  { %v2346_v14 = vpop.xlane.xlu0 %2345 }
0x18cf   :  { %v2371_v13 = vadd.f32 %v2433_v9, %v2346_v14 }
0x18d1   :  { %2380 = vst.msk [vmem:[%s3666_s9 + $0x10] sm:$0xff] %vm2377_vm2, %v2371_v13 }
0x18d2   :  { %v2349_v15 = vpop.xlane.xlu0 %2348 }
0x18d3   :  { %v2372_v16 = vadd.f32 %v2433_v9, %v2349_v15 }
0x18d5   :  { %2381 = vst.msk [vmem:[%s3666_s9 + $0x18] sm:$0xff] %vm2377_vm2, %v2372_v16 }
0x18d6   :  { %v2355_v17 = vpop.xlane.xlu0 %2354 }
0x18d7   :  { %v2374_v18 = vadd.f32 %v2433_v9, %v2355_v17 }
0x18d9   :  { %2383 = vst.msk [vmem:[%s3666_s9 + $0x28] sm:$0xff] %vm2377_vm2, %v2374_v18 }
0x1905   :  { %v2312_v19 = vpop.permute.xlu1 %2311 }
0x1906   :  { %2314 = vst.msk [vmem:[#allocation2 + $0x38] sm:$0xff] %vm145_vm1, %v2312_v19 }
0x190d   :  { %v2322_v20 = vld [vmem:[#allocation2 + $0x38] sm:$0xff] }
0x190e   :  { %v2337_v21 = vmul.f32 %v2432_v48, %v2322_v20 }
0x1910   :  { %v2359_v22 = vsel %vm145_vm1, %v2337_v21, 0.0 }
0x1911   :  { %2360 = vadd.xlane.f32.xlu0 %v2359_v22 }
0x1944   :  { %v2343_v23 = vpop.xlane.xlu1 %2342 }
0x1945   :  { %v2370_v24 = vadd.f32 %v2433_v9, %v2343_v23 }
0x1947   :  { %2379 = vst.msk [vmem:[%s3666_s9 + $0x8] sm:$0xff] %vm2377_vm2, %v2370_v24 }
0x1948   :  { %v2352_v25 = vpop.xlane.xlu1 %2351 }
0x1949   :  { %v2373_v26 = vadd.f32 %v2433_v9, %v2352_v25 }
0x194b   :  { %2382 = vst.msk [vmem:[%s3666_s9 + $0x20] sm:$0xff] %vm2377_vm2, %v2373_v26 }
0x194c   :  { %v2358_v7 = vpop.xlane.xlu1 %2357 }
0x194d   :  { %v2375_v27 = vadd.f32 %v2433_v9, %v2358_v7 }
0x194f   :  { %2384 = vst.msk [vmem:[%s3666_s9 + $0x30] sm:$0xff] %vm2377_vm2, %v2375_v27 }
0x199e   :  { %v2361_v28 = vpop.xlane.xlu0 %2360 }
0x199f   :  { %v2376_v10 = vadd.f32 %v2433_v9, %v2361_v28 }
0x19a1   :  { %2385 = vst.msk [vmem:[%s3666_s9 + $0x38] sm:$0xff] %vm2377_vm2, %v2376_v10 }
0x19a2   :  { %2390 = vsyncpa [#allocation5], 1 }

</bundles_post_ra>
